<compile_context>
chip_gen: v7x
topology: tpu7x:2x2x1
jax: 0.10.0
libtpu: 0.0.40
codegen_flags: <defaults>
</compile_context>

<pallas_src>
import jax
import jax.numpy as jnp
from jax.experimental import pallas as pl
from jax.experimental.pallas import tpu as pltpu

PARAM_DTYPE = jnp.bfloat16   # MXU-native on all current TPU generations.

_VMEM = pl.BlockSpec(memory_space=pltpu.MemorySpace.VMEM)


def _round_up(x, m):
    return (x + m - 1) // m * m


# ----------------------------------------------------------------------------
# Fused kernel: (folded) embedding -> encoder LSTM stack -> decoder LSTM stack
#               -> batched fc_out
# ----------------------------------------------------------------------------
def make_seq2seq_kernel(n_layers):
    L = n_layers

    def kernel(*refs):
        src_ids_ref, trg0_ref, enc_x2g_ref, dec_x2g_ref = refs[0:4]
        idx = 4
        enc_wx = refs[idx:idx + (L - 1)]; idx += L - 1     # layers 1..L-1, (H,4H)
        enc_wh = refs[idx:idx + L]; idx += L               # layers 0..L-1, (H,4H)
        enc_b = refs[idx:idx + L]; idx += L                # (1,4H) f32
        dec_wx = refs[idx:idx + (L - 1)]; idx += L - 1
        dec_wh = refs[idx:idx + L]; idx += L
        dec_b = refs[idx:idx + L]; idx += L
        fc_w_ref = refs[idx]
        fc_b_ref = refs[idx + 1]
        out_ref = refs[idx + 2]

        T, B, O = out_ref.shape                # decoder len, padded batch, padded vocab
        H = enc_wh[0].shape[0]                 # hidden dim
        G = 4 * H                              # gate width (lanes)
        S = src_ids_ref.shape[0] // B          # encoder length
        Ve = enc_x2g_ref.shape[0]              # encoder vocab
        Vd = dec_x2g_ref.shape[0]              # decoder vocab

        # ---- hoisted weight / bias loads (JAX does not CSE these) ----------
        enc_wh_v = [r[...] for r in enc_wh]
        dec_wh_v = [r[...] for r in dec_wh]
        enc_wx_v = [r[...] for r in enc_wx]
        dec_wx_v = [r[...] for r in dec_wx]
        enc_b_raw = [r[...] for r in enc_b]                          # (1, G)
        dec_b_raw = [r[...] for r in dec_b]
        enc_b_bc = [None] + [jnp.broadcast_to(b, (B, G)) for b in enc_b_raw[1:]]
        dec_b_bc = [None] + [jnp.broadcast_to(b, (B, G)) for b in dec_b_raw[1:]]
        fc_w = fc_w_ref[...]
        fc_b = fc_b_ref[...]

        # ---- batched layer-0 input pre-activations (off the serial chain) --
        # One one-hot MXU matmul against the pre-folded (vocab, 4H) table
        # (= embedding @ W_ih_l0^T); layer-0 bias folded in here too.
        ids = src_ids_ref[...]                                       # (S*B, 1)
        cols = jax.lax.broadcasted_iota(jnp.int32, (S * B, Ve), 1)
        onehot = (ids == cols).astype(PARAM_DTYPE)
        enc_xg = jnp.dot(onehot, enc_x2g_ref[...],
                         preferred_element_type=jnp.float32) + enc_b_raw[0]

        # Decoder input is trg[0] at EVERY step (reference bug reproduced):
        # its layer-0 gate contribution is a constant, compute it once.
        cols_d = jax.lax.broadcasted_iota(jnp.int32, (B, Vd), 1)
        onehot_d = (trg0_ref[...] == cols_d).astype(PARAM_DTYPE)
        dec_xg0 = jnp.dot(onehot_d, dec_x2g_ref[...],
                          preferred_element_type=jnp.float32) + dec_b_raw[0]

        def gates_to_hc(gates, c):
            # Full-vreg (8,128) nonlinearities: one sigmoid + one tanh over all
            # four gates, then H-wide picks.  Gate order matches PyTorch i,f,g,o.
            sig = jax.nn.sigmoid(gates)
            tnh = jnp.tanh(gates)
            i_g = sig[:, 0 * H:1 * H]
            f_g = sig[:, 1 * H:2 * H]
            g_g = tnh[:, 2 * H:3 * H]
            o_g = sig[:, 3 * H:4 * H]
            c_new = f_g * c + i_g * g_g
            h_new = o_g * jnp.tanh(c_new)
            return h_new, c_new

        hs = [jnp.zeros((B, H), jnp.float32) for _ in range(L)]
        cs = [jnp.zeros((B, H), jnp.float32) for _ in range(L)]

        # ---- encoder: only h @ W_hh (and inter-layer x @ W_ih) stay on the
        #      serialized chain; weights are VMEM/vreg resident ----
        for t in range(S):
            xg0 = enc_xg[t * B:(t + 1) * B, :]            # precomputed layer-0 part
            for l in range(L):
                hg = jnp.dot(hs[l].astype(PARAM_DTYPE), enc_wh_v[l],
                             preferred_element_type=jnp.float32)
                if l == 0:
                    gates = xg0 + hg
                else:
                    xgl = jnp.dot(hs[l - 1].astype(PARAM_DTYPE), enc_wx_v[l - 1],
                                  preferred_element_type=jnp.float32)
                    gates = enc_b_bc[l] + xgl + hg
                hs[l], cs[l] = gates_to_hc(gates, cs[l])
                # inter-layer dropout is identity (eval / p=0)

        # ---- decoder -------------------------------------------------------
        out_ref[0, :, :] = jnp.zeros((B, O), out_ref.dtype)   # outputs[0] stays 0
        if T > 1:
            h_top = []
            for _ in range(1, T):
                for l in range(L):
                    hg = jnp.dot(hs[l].astype(PARAM_DTYPE), dec_wh_v[l],
                                 preferred_element_type=jnp.float32)
                    if l == 0:
                        gates = dec_xg0 + hg
                    else:
                        xgl = jnp.dot(hs[l - 1].astype(PARAM_DTYPE), dec_wx_v[l - 1],
                                      preferred_element_type=jnp.float32)
                        gates = dec_b_bc[l] + xgl + hg
                    hs[l], cs[l] = gates_to_hc(gates, cs[l])
                h_top.append(hs[L - 1])

            # Batched fc_out: one matmul + one lane-dense (128-wide) store.
            h_cat = jnp.concatenate(h_top, axis=0).astype(PARAM_DTYPE)  # ((T-1)*B, H)
            logits = jnp.dot(h_cat, fc_w,
                             preferred_element_type=jnp.float32) + fc_b
            out_ref[1:T, :, :] = logits.reshape(T - 1, B, O)
        # TODO(synk): teacher_force/argmax branch of the reference never feeds
        # back into the decoder (dead code), so it is intentionally omitted.

    return kernel


# ----------------------------------------------------------------------------
# Parameters: raw (f32, PyTorch-equivalent layout) + packed (kernel layout)
# ----------------------------------------------------------------------------
def make_params(key, input_dim, output_dim, emb_dim, hid_dim, n_layers):
    """Synthetic parameters. Layout notes vs PyTorch:
       *_wx[l] = W_ih^T  (in, 4H);  *_wh[l] = W_hh^T (H, 4H);  *_b[l] = b_ih + b_hh."""
    def nrm(k, shape, scale=0.1):
        return scale * jax.random.normal(k, shape, dtype=jnp.float32)

    keys = iter(jax.random.split(key, 4 + 6 * n_layers))
    raw = {
        "enc_emb": nrm(next(keys), (input_dim, emb_dim)),
        "dec_emb": nrm(next(keys), (output_dim, emb_dim)),
        "fc_w": nrm(next(keys), (hid_dim, output_dim)),
        "fc_b": nrm(next(keys), (1, output_dim)),
        "enc_wx": [], "enc_wh": [], "enc_b": [],
        "dec_wx": [], "dec_wh": [], "dec_b": [],
        "hid_dim": hid_dim, "n_layers": n_layers, "output_dim": output_dim,
    }
    for side in ("enc", "dec"):
        for l in range(n_layers):
            in_size = emb_dim if l == 0 else hid_dim
            raw[side + "_wx"].append(nrm(next(keys), (in_size, 4 * hid_dim)))
            raw[side + "_wh"].append(nrm(next(keys), (hid_dim, 4 * hid_dim)))
            raw[side + "_b"].append(nrm(next(keys), (1, 4 * hid_dim)))
    return raw


def pack_params(raw):
    """Kernel-side packing: fold embedding @ W_ih_l0 into (vocab, 4H), bf16 MXU
    operands, fc_out column-padded to a lane-dense 128 multiple."""
    out_dim = raw["output_dim"]
    o_pad = _round_up(out_dim, 128)
    packed = {
        "enc_x2g": (raw["enc_emb"] @ raw["enc_wx"][0]).astype(PARAM_DTYPE),
        "dec_x2g": (raw["dec_emb"] @ raw["dec_wx"][0]).astype(PARAM_DTYPE),
        "enc_wx": [w.astype(PARAM_DTYPE) for w in raw["enc_wx"][1:]],
        "dec_wx": [w.astype(PARAM_DTYPE) for w in raw["dec_wx"][1:]],
        "enc_wh": [w.astype(PARAM_DTYPE) for w in raw["enc_wh"]],
        "dec_wh": [w.astype(PARAM_DTYPE) for w in raw["dec_wh"]],
        "enc_b": list(raw["enc_b"]),
        "dec_b": list(raw["dec_b"]),
        "fc_w": jnp.pad(raw["fc_w"], ((0, 0), (0, o_pad - out_dim))).astype(PARAM_DTYPE),
        "fc_b": jnp.pad(raw["fc_b"], ((0, 0), (0, o_pad - out_dim))),
        "output_dim": out_dim,
    }
    return packed


# ----------------------------------------------------------------------------
# Host-side glue: padding + single pallas_call (all weights VMEM-resident)
# ----------------------------------------------------------------------------
def seq2seq_forward(src, trg, packed, n_layers):
    S, B = src.shape
    T = trg.shape[0]
    b_pad = _round_up(max(B, 8), 8)          # full sublanes
    o_pad = packed["fc_w"].shape[1]          # lane-dense logits (>=128)
    output_dim = packed["output_dim"]

    # Token ids, batch padded with id 0 (pad rows are sliced off at the end).
    src_p = jnp.pad(src, ((0, 0), (0, b_pad - B))).astype(jnp.int32).reshape(S * b_pad, 1)
    trg0_p = jnp.pad(trg[0], (0, b_pad - B)).astype(jnp.int32)[:, None]

    args = ([src_p, trg0_p, packed["enc_x2g"], packed["dec_x2g"]]
            + list(packed["enc_wx"]) + list(packed["enc_wh"]) + list(packed["enc_b"])
            + list(packed["dec_wx"]) + list(packed["dec_wh"]) + list(packed["dec_b"])
            + [packed["fc_w"], packed["fc_b"]])

    # Working set ~0.1 MiB: everything fits VMEM on v5e/v6e/v7x with no tiling.
    # NOTE(v7x scaling): for batch >= 16 add a leading "parallel" grid axis over
    # batch so both TensorCores run an independent shard of the recurrence.
    out_pad = pl.pallas_call(
        make_seq2seq_kernel(n_layers),
        out_shape=jax.ShapeDtypeStruct((T, b_pad, o_pad), jnp.float32),
        in_specs=[_VMEM] * len(args),
        out_specs=_VMEM,
        compiler_params=pltpu.CompilerParams(vmem_limit_bytes=32 * 1024 * 1024),
    )(*args)

    return out_pad[:, :B, :output_dim]


# ----------------------------------------------------------------------------
# Pure-JAX f32 reference (mirrors the PyTorch module semantics)
# ----------------------------------------------------------------------------
def reference_forward(src, trg, raw):
    S, B = src.shape
    T = trg.shape[0]
    H = raw["hid_dim"]
    L = raw["n_layers"]
    out_dim = raw["output_dim"]
    hs = [jnp.zeros((B, H), jnp.float32) for _ in range(L)]
    cs = [jnp.zeros((B, H), jnp.float32) for _ in range(L)]

    def step(x, h, c, wx, wh, b):
        g = x @ wx + h @ wh + b
        i = jax.nn.sigmoid(g[:, 0 * H:1 * H])
        f = jax.nn.sigmoid(g[:, 1 * H:2 * H])
        gg = jnp.tanh(g[:, 2 * H:3 * H])
        o = jax.nn.sigmoid(g[:, 3 * H:4 * H])
        c2 = f * c + i * gg
        return o * jnp.tanh(c2), c2

    for t in range(S):
        x = raw["enc_emb"][src[t]]
        for l in range(L):
            hs[l], cs[l] = step(x, hs[l], cs[l],
                                raw["enc_wx"][l], raw["enc_wh"][l], raw["enc_b"][l])
            x = hs[l]
    outputs = jnp.zeros((T, B, out_dim), jnp.float32)
    dec_x = raw["dec_emb"][trg[0]]        # decoder_input is never updated (ref bug)
    for i in range(1, T):
        x = dec_x
        for l in range(L):
            hs[l], cs[l] = step(x, hs[l], cs[l],
                                raw["dec_wx"][l], raw["dec_wh"][l], raw["dec_b"][l])
            x = hs[l]
        outputs = outputs.at[i].set(x @ raw["fc_w"] + raw["fc_b"])
    return outputs


if __name__ == "__main__":
    INPUT_DIM = 16    # encoder vocab
    OUTPUT_DIM = 16   # decoder vocab
    EMB_DIM = 32
    HID_DIM = 32
    N_LAYERS = 2
    SRC_LEN = 6
    TRG_LEN = 8
    BATCH = 2

    key = jax.random.PRNGKey(0)
    k_param, k_src, k_trg = jax.random.split(key, 3)

    raw = make_params(k_param, INPUT_DIM, OUTPUT_DIM, EMB_DIM, HID_DIM, N_LAYERS)
    packed = pack_params(raw)
    src = jax.random.randint(k_src, (SRC_LEN, BATCH), 0, INPUT_DIM, dtype=jnp.int32)
    trg = jax.random.randint(k_trg, (TRG_LEN, BATCH), 0, OUTPUT_DIM, dtype=jnp.int32)

    out = seq2seq_forward(src, trg, packed, N_LAYERS)
    out = jax.block_until_ready(out)
    assert out.shape == (TRG_LEN, BATCH, OUTPUT_DIM)
    assert bool(jnp.all(out[0] == 0.0))          # reference: outputs[0] untouched
    assert bool(jnp.all(jnp.isfinite(out)))

    ref = reference_forward(src, trg, raw)
    max_err = float(jnp.max(jnp.abs(out - ref)))
    assert max_err < 2e-2, f"mismatch vs f32 reference: max abs err {max_err}"
    print("KERNEL_OK")
</pallas_src>

<mosaic_0001>
module attributes {stable_mosaic.version = 11 : i64} {
  func.func @kernel(%arg0: memref<48x1xi32, #tpu.memory_space<vmem>>, %arg1: memref<8x1xi32, #tpu.memory_space<vmem>>, %arg2: memref<16x128xbf16, #tpu.memory_space<vmem>>, %arg3: memref<16x128xbf16, #tpu.memory_space<vmem>>, %arg4: memref<32x128xbf16, #tpu.memory_space<vmem>>, %arg5: memref<32x128xbf16, #tpu.memory_space<vmem>>, %arg6: memref<32x128xbf16, #tpu.memory_space<vmem>>, %arg7: memref<1x128xf32, #tpu.memory_space<vmem>>, %arg8: memref<1x128xf32, #tpu.memory_space<vmem>>, %arg9: memref<32x128xbf16, #tpu.memory_space<vmem>>, %arg10: memref<32x128xbf16, #tpu.memory_space<vmem>>, %arg11: memref<32x128xbf16, #tpu.memory_space<vmem>>, %arg12: memref<1x128xf32, #tpu.memory_space<vmem>>, %arg13: memref<1x128xf32, #tpu.memory_space<vmem>>, %arg14: memref<32x128xbf16, #tpu.memory_space<vmem>>, %arg15: memref<1x128xf32, #tpu.memory_space<vmem>>, %arg16: memref<8x8x128xf32, #tpu.memory_space<vmem>>) attributes {dimension_semantics = [], scalar_prefetch = 0 : i64, scratch_operands = 0 : i64, tpu.core_type = #tpu.core_type<tc>} {
    %c0 = arith.constant 0 : index
    %c0_0 = arith.constant 0 : index
    %0 = vector.load %arg5[%c0, %c0_0] : memref<32x128xbf16, #tpu.memory_space<vmem>>, vector<32x128xbf16>
    %c0_1 = arith.constant 0 : index
    %c0_2 = arith.constant 0 : index
    %1 = vector.load %arg6[%c0_1, %c0_2] : memref<32x128xbf16, #tpu.memory_space<vmem>>, vector<32x128xbf16>
    %c0_3 = arith.constant 0 : index
    %c0_4 = arith.constant 0 : index
    %2 = vector.load %arg10[%c0_3, %c0_4] : memref<32x128xbf16, #tpu.memory_space<vmem>>, vector<32x128xbf16>
    %c0_5 = arith.constant 0 : index
    %c0_6 = arith.constant 0 : index
    %3 = vector.load %arg11[%c0_5, %c0_6] : memref<32x128xbf16, #tpu.memory_space<vmem>>, vector<32x128xbf16>
    %c0_7 = arith.constant 0 : index
    %c0_8 = arith.constant 0 : index
    %4 = vector.load %arg4[%c0_7, %c0_8] : memref<32x128xbf16, #tpu.memory_space<vmem>>, vector<32x128xbf16>
    %c0_9 = arith.constant 0 : index
    %c0_10 = arith.constant 0 : index
    %5 = vector.load %arg9[%c0_9, %c0_10] : memref<32x128xbf16, #tpu.memory_space<vmem>>, vector<32x128xbf16>
    %c0_11 = arith.constant 0 : index
    %c0_12 = arith.constant 0 : index
    %6 = vector.load %arg7[%c0_11, %c0_12] : memref<1x128xf32, #tpu.memory_space<vmem>>, vector<1x128xf32>
    %c0_13 = arith.constant 0 : index
    %c0_14 = arith.constant 0 : index
    %7 = vector.load %arg8[%c0_13, %c0_14] : memref<1x128xf32, #tpu.memory_space<vmem>>, vector<1x128xf32>
    %c0_15 = arith.constant 0 : index
    %c0_16 = arith.constant 0 : index
    %8 = vector.load %arg12[%c0_15, %c0_16] : memref<1x128xf32, #tpu.memory_space<vmem>>, vector<1x128xf32>
    %c0_17 = arith.constant 0 : index
    %c0_18 = arith.constant 0 : index
    %9 = vector.load %arg13[%c0_17, %c0_18] : memref<1x128xf32, #tpu.memory_space<vmem>>, vector<1x128xf32>
    %10 = vector.shape_cast %7 : vector<1x128xf32> to vector<1x128xf32>
    %11 = vector.broadcast %10 : vector<1x128xf32> to vector<8x128xf32>
    %12 = vector.shape_cast %9 : vector<1x128xf32> to vector<1x128xf32>
    %13 = vector.broadcast %12 : vector<1x128xf32> to vector<8x128xf32>
    %c0_19 = arith.constant 0 : index
    %c0_20 = arith.constant 0 : index
    %14 = vector.load %arg14[%c0_19, %c0_20] : memref<32x128xbf16, #tpu.memory_space<vmem>>, vector<32x128xbf16>
    %c0_21 = arith.constant 0 : index
    %c0_22 = arith.constant 0 : index
    %15 = vector.load %arg15[%c0_21, %c0_22] : memref<1x128xf32, #tpu.memory_space<vmem>>, vector<1x128xf32>
    %c0_23 = arith.constant 0 : index
    %c0_24 = arith.constant 0 : index
    %16 = vector.load %arg0[%c0_23, %c0_24] : memref<48x1xi32, #tpu.memory_space<vmem>>, vector<48x1xi32>
    %17 = tpu.iota {dimensions = array<i32: 1>} : vector<48x16xi32>
    %18 = vector.broadcast %16 : vector<48x1xi32> to vector<48x16xi32>
    %19 = arith.cmpi eq, %18, %17 : vector<48x16xi32>
    %20 = arith.extui %19 : vector<48x16xi1> to vector<48x16xi32>
    %21 = arith.sitofp %20 : vector<48x16xi32> to vector<48x16xf32>
    %22 = arith.truncf %21 : vector<48x16xf32> to vector<48x16xbf16>
    %c0_25 = arith.constant 0 : index
    %c0_26 = arith.constant 0 : index
    %23 = vector.load %arg2[%c0_25, %c0_26] : memref<16x128xbf16, #tpu.memory_space<vmem>>, vector<16x128xbf16>
    %cst = arith.constant dense<0.000000e+00> : vector<48x128xf32>
    %24 = tpu.matmul %22, %23, %cst {dimension_numbers = #tpu.dot_dimension_numbers<[1], [0], [0], [1], [0, 0, 1, 1], [], []>} : vector<48x16xbf16>, vector<16x128xbf16>, vector<48x128xf32> -> vector<48x128xf32>
    %25 = vector.broadcast %6 : vector<1x128xf32> to vector<48x128xf32>
    %26 = arith.addf %24, %25 : vector<48x128xf32>
    %27 = tpu.iota {dimensions = array<i32: 1>} : vector<8x16xi32>
    %c0_27 = arith.constant 0 : index
    %c0_28 = arith.constant 0 : index
    %28 = vector.load %arg1[%c0_27, %c0_28] : memref<8x1xi32, #tpu.memory_space<vmem>>, vector<8x1xi32>
    %29 = vector.broadcast %28 : vector<8x1xi32> to vector<8x16xi32>
    %30 = arith.cmpi eq, %29, %27 : vector<8x16xi32>
    %31 = arith.extui %30 : vector<8x16xi1> to vector<8x16xi32>
    %32 = arith.sitofp %31 : vector<8x16xi32> to vector<8x16xf32>
    %33 = arith.truncf %32 : vector<8x16xf32> to vector<8x16xbf16>
    %c0_29 = arith.constant 0 : index
    %c0_30 = arith.constant 0 : index
    %34 = vector.load %arg3[%c0_29, %c0_30] : memref<16x128xbf16, #tpu.memory_space<vmem>>, vector<16x128xbf16>
    %cst_31 = arith.constant dense<0.000000e+00> : vector<8x128xf32>
    %35 = tpu.matmul %33, %34, %cst_31 {dimension_numbers = #tpu.dot_dimension_numbers<[1], [0], [0], [1], [0, 0, 1, 1], [], []>} : vector<8x16xbf16>, vector<16x128xbf16>, vector<8x128xf32> -> vector<8x128xf32>
    %36 = vector.broadcast %8 : vector<1x128xf32> to vector<8x128xf32>
    %37 = arith.addf %35, %36 : vector<8x128xf32>
    %cst_32 = arith.constant 0.000000e+00 : f32
    %38 = vector.broadcast %cst_32 : f32 to vector<8x32xf32>
    %cst_33 = arith.constant 0.000000e+00 : f32
    %39 = vector.broadcast %cst_33 : f32 to vector<8x32xf32>
    %cst_34 = arith.constant 0.000000e+00 : f32
    %40 = vector.broadcast %cst_34 : f32 to vector<8x32xf32>
    %cst_35 = arith.constant 0.000000e+00 : f32
    %41 = vector.broadcast %cst_35 : f32 to vector<8x32xf32>
    %42 = vector.extract_strided_slice %26 {offsets = [0, 0], sizes = [8, 128], strides = [1, 1]} : vector<48x128xf32> to vector<8x128xf32>
    %43 = arith.truncf %38 : vector<8x32xf32> to vector<8x32xbf16>
    %cst_36 = arith.constant dense<0.000000e+00> : vector<8x128xf32>
    %44 = tpu.matmul %43, %0, %cst_36 {dimension_numbers = #tpu.dot_dimension_numbers<[1], [0], [0], [1], [0, 0, 1, 1], [], []>} : vector<8x32xbf16>, vector<32x128xbf16>, vector<8x128xf32> -> vector<8x128xf32>
    %45 = arith.addf %42, %44 : vector<8x128xf32>
    %46 = arith.negf %45 : vector<8x128xf32>
    %47 = math.exp %46 : vector<8x128xf32>
    %cst_37 = arith.constant 1.000000e+00 : f32
    %48 = vector.broadcast %cst_37 : f32 to vector<8x128xf32>
    %49 = arith.addf %48, %47 : vector<8x128xf32>
    %50 = arith.divf %48, %49 : vector<8x128xf32>
    %51 = math.tanh %45 : vector<8x128xf32>
    %52 = vector.extract_strided_slice %50 {offsets = [0, 0], sizes = [8, 32], strides = [1, 1]} : vector<8x128xf32> to vector<8x32xf32>
    %53 = vector.extract_strided_slice %50 {offsets = [0, 32], sizes = [8, 32], strides = [1, 1]} : vector<8x128xf32> to vector<8x32xf32>
    %54 = vector.extract_strided_slice %51 {offsets = [0, 64], sizes = [8, 32], strides = [1, 1]} : vector<8x128xf32> to vector<8x32xf32>
    %55 = vector.extract_strided_slice %50 {offsets = [0, 96], sizes = [8, 32], strides = [1, 1]} : vector<8x128xf32> to vector<8x32xf32>
    %56 = arith.mulf %53, %40 : vector<8x32xf32>
    %57 = arith.mulf %52, %54 : vector<8x32xf32>
    %58 = arith.addf %56, %57 : vector<8x32xf32>
    %59 = math.tanh %58 : vector<8x32xf32>
    %60 = arith.mulf %55, %59 : vector<8x32xf32>
    %61 = arith.truncf %39 : vector<8x32xf32> to vector<8x32xbf16>
    %cst_38 = arith.constant dense<0.000000e+00> : vector<8x128xf32>
    %62 = tpu.matmul %61, %1, %cst_38 {dimension_numbers = #tpu.dot_dimension_numbers<[1], [0], [0], [1], [0, 0, 1, 1], [], []>} : vector<8x32xbf16>, vector<32x128xbf16>, vector<8x128xf32> -> vector<8x128xf32>
    %63 = arith.truncf %60 : vector<8x32xf32> to vector<8x32xbf16>
    %cst_39 = arith.constant dense<0.000000e+00> : vector<8x128xf32>
    %64 = tpu.matmul %63, %4, %cst_39 {dimension_numbers = #tpu.dot_dimension_numbers<[1], [0], [0], [1], [0, 0, 1, 1], [], []>} : vector<8x32xbf16>, vector<32x128xbf16>, vector<8x128xf32> -> vector<8x128xf32>
    %65 = arith.addf %11, %64 : vector<8x128xf32>
    %66 = arith.addf %65, %62 : vector<8x128xf32>
    %67 = arith.negf %66 : vector<8x128xf32>
    %68 = math.exp %67 : vector<8x128xf32>
    %cst_40 = arith.constant 1.000000e+00 : f32
    %69 = vector.broadcast %cst_40 : f32 to vector<8x128xf32>
    %70 = arith.addf %69, %68 : vector<8x128xf32>
    %71 = arith.divf %69, %70 : vector<8x128xf32>
    %72 = math.tanh %66 : vector<8x128xf32>
    %73 = vector.extract_strided_slice %71 {offsets = [0, 0], sizes = [8, 32], strides = [1, 1]} : vector<8x128xf32> to vector<8x32xf32>
    %74 = vector.extract_strided_slice %71 {offsets = [0, 32], sizes = [8, 32], strides = [1, 1]} : vector<8x128xf32> to vector<8x32xf32>
    %75 = vector.extract_strided_slice %72 {offsets = [0, 64], sizes = [8, 32], strides = [1, 1]} : vector<8x128xf32> to vector<8x32xf32>
    %76 = vector.extract_strided_slice %71 {offsets = [0, 96], sizes = [8, 32], strides = [1, 1]} : vector<8x128xf32> to vector<8x32xf32>
    %77 = arith.mulf %74, %41 : vector<8x32xf32>
    %78 = arith.mulf %73, %75 : vector<8x32xf32>
    %79 = arith.addf %77, %78 : vector<8x32xf32>
    %80 = math.tanh %79 : vector<8x32xf32>
    %81 = arith.mulf %76, %80 : vector<8x32xf32>
    %82 = vector.extract_strided_slice %26 {offsets = [8, 0], sizes = [8, 128], strides = [1, 1]} : vector<48x128xf32> to vector<8x128xf32>
    %83 = arith.truncf %60 : vector<8x32xf32> to vector<8x32xbf16>
    %cst_41 = arith.constant dense<0.000000e+00> : vector<8x128xf32>
    %84 = tpu.matmul %83, %0, %cst_41 {dimension_numbers = #tpu.dot_dimension_numbers<[1], [0], [0], [1], [0, 0, 1, 1], [], []>} : vector<8x32xbf16>, vector<32x128xbf16>, vector<8x128xf32> -> vector<8x128xf32>
    %85 = arith.addf %82, %84 : vector<8x128xf32>
    %86 = arith.negf %85 : vector<8x128xf32>
    %87 = math.exp %86 : vector<8x128xf32>
    %cst_42 = arith.constant 1.000000e+00 : f32
    %88 = vector.broadcast %cst_42 : f32 to vector<8x128xf32>
    %89 = arith.addf %88, %87 : vector<8x128xf32>
    %90 = arith.divf %88, %89 : vector<8x128xf32>
    %91 = math.tanh %85 : vector<8x128xf32>
    %92 = vector.extract_strided_slice %90 {offsets = [0, 0], sizes = [8, 32], strides = [1, 1]} : vector<8x128xf32> to vector<8x32xf32>
    %93 = vector.extract_strided_slice %90 {offsets = [0, 32], sizes = [8, 32], strides = [1, 1]} : vector<8x128xf32> to vector<8x32xf32>
    %94 = vector.extract_strided_slice %91 {offsets = [0, 64], sizes = [8, 32], strides = [1, 1]} : vector<8x128xf32> to vector<8x32xf32>
    %95 = vector.extract_strided_slice %90 {offsets = [0, 96], sizes = [8, 32], strides = [1, 1]} : vector<8x128xf32> to vector<8x32xf32>
    %96 = arith.mulf %93, %58 : vector<8x32xf32>
    %97 = arith.mulf %92, %94 : vector<8x32xf32>
    %98 = arith.addf %96, %97 : vector<8x32xf32>
    %99 = math.tanh %98 : vector<8x32xf32>
    %100 = arith.mulf %95, %99 : vector<8x32xf32>
    %101 = arith.truncf %81 : vector<8x32xf32> to vector<8x32xbf16>
    %cst_43 = arith.constant dense<0.000000e+00> : vector<8x128xf32>
    %102 = tpu.matmul %101, %1, %cst_43 {dimension_numbers = #tpu.dot_dimension_numbers<[1], [0], [0], [1], [0, 0, 1, 1], [], []>} : vector<8x32xbf16>, vector<32x128xbf16>, vector<8x128xf32> -> vector<8x128xf32>
    %103 = arith.truncf %100 : vector<8x32xf32> to vector<8x32xbf16>
    %cst_44 = arith.constant dense<0.000000e+00> : vector<8x128xf32>
    %104 = tpu.matmul %103, %4, %cst_44 {dimension_numbers = #tpu.dot_dimension_numbers<[1], [0], [0], [1], [0, 0, 1, 1], [], []>} : vector<8x32xbf16>, vector<32x128xbf16>, vector<8x128xf32> -> vector<8x128xf32>
    %105 = arith.addf %11, %104 : vector<8x128xf32>
    %106 = arith.addf %105, %102 : vector<8x128xf32>
    %107 = arith.negf %106 : vector<8x128xf32>
    %108 = math.exp %107 : vector<8x128xf32>
    %cst_45 = arith.constant 1.000000e+00 : f32
    %109 = vector.broadcast %cst_45 : f32 to vector<8x128xf32>
    %110 = arith.addf %109, %108 : vector<8x128xf32>
    %111 = arith.divf %109, %110 : vector<8x128xf32>
    %112 = math.tanh %106 : vector<8x128xf32>
    %113 = vector.extract_strided_slice %111 {offsets = [0, 0], sizes = [8, 32], strides = [1, 1]} : vector<8x128xf32> to vector<8x32xf32>
    %114 = vector.extract_strided_slice %111 {offsets = [0, 32], sizes = [8, 32], strides = [1, 1]} : vector<8x128xf32> to vector<8x32xf32>
    %115 = vector.extract_strided_slice %112 {offsets = [0, 64], sizes = [8, 32], strides = [1, 1]} : vector<8x128xf32> to vector<8x32xf32>
    %116 = vector.extract_strided_slice %111 {offsets = [0, 96], sizes = [8, 32], strides = [1, 1]} : vector<8x128xf32> to vector<8x32xf32>
    %117 = arith.mulf %114, %79 : vector<8x32xf32>
    %118 = arith.mulf %113, %115 : vector<8x32xf32>
    %119 = arith.addf %117, %118 : vector<8x32xf32>
    %120 = math.tanh %119 : vector<8x32xf32>
    %121 = arith.mulf %116, %120 : vector<8x32xf32>
    %122 = vector.extract_strided_slice %26 {offsets = [16, 0], sizes = [8, 128], strides = [1, 1]} : vector<48x128xf32> to vector<8x128xf32>
    %123 = arith.truncf %100 : vector<8x32xf32> to vector<8x32xbf16>
    %cst_46 = arith.constant dense<0.000000e+00> : vector<8x128xf32>
    %124 = tpu.matmul %123, %0, %cst_46 {dimension_numbers = #tpu.dot_dimension_numbers<[1], [0], [0], [1], [0, 0, 1, 1], [], []>} : vector<8x32xbf16>, vector<32x128xbf16>, vector<8x128xf32> -> vector<8x128xf32>
    %125 = arith.addf %122, %124 : vector<8x128xf32>
    %126 = arith.negf %125 : vector<8x128xf32>
    %127 = math.exp %126 : vector<8x128xf32>
    %cst_47 = arith.constant 1.000000e+00 : f32
    %128 = vector.broadcast %cst_47 : f32 to vector<8x128xf32>
    %129 = arith.addf %128, %127 : vector<8x128xf32>
    %130 = arith.divf %128, %129 : vector<8x128xf32>
    %131 = math.tanh %125 : vector<8x128xf32>
    %132 = vector.extract_strided_slice %130 {offsets = [0, 0], sizes = [8, 32], strides = [1, 1]} : vector<8x128xf32> to vector<8x32xf32>
    %133 = vector.extract_strided_slice %130 {offsets = [0, 32], sizes = [8, 32], strides = [1, 1]} : vector<8x128xf32> to vector<8x32xf32>
    %134 = vector.extract_strided_slice %131 {offsets = [0, 64], sizes = [8, 32], strides = [1, 1]} : vector<8x128xf32> to vector<8x32xf32>
    %135 = vector.extract_strided_slice %130 {offsets = [0, 96], sizes = [8, 32], strides = [1, 1]} : vector<8x128xf32> to vector<8x32xf32>
    %136 = arith.mulf %133, %98 : vector<8x32xf32>
    %137 = arith.mulf %132, %134 : vector<8x32xf32>
    %138 = arith.addf %136, %137 : vector<8x32xf32>
    %139 = math.tanh %138 : vector<8x32xf32>
    %140 = arith.mulf %135, %139 : vector<8x32xf32>
    %141 = arith.truncf %121 : vector<8x32xf32> to vector<8x32xbf16>
    %cst_48 = arith.constant dense<0.000000e+00> : vector<8x128xf32>
    %142 = tpu.matmul %141, %1, %cst_48 {dimension_numbers = #tpu.dot_dimension_numbers<[1], [0], [0], [1], [0, 0, 1, 1], [], []>} : vector<8x32xbf16>, vector<32x128xbf16>, vector<8x128xf32> -> vector<8x128xf32>
    %143 = arith.truncf %140 : vector<8x32xf32> to vector<8x32xbf16>
    %cst_49 = arith.constant dense<0.000000e+00> : vector<8x128xf32>
    %144 = tpu.matmul %143, %4, %cst_49 {dimension_numbers = #tpu.dot_dimension_numbers<[1], [0], [0], [1], [0, 0, 1, 1], [], []>} : vector<8x32xbf16>, vector<32x128xbf16>, vector<8x128xf32> -> vector<8x128xf32>
    %145 = arith.addf %11, %144 : vector<8x128xf32>
    %146 = arith.addf %145, %142 : vector<8x128xf32>
    %147 = arith.negf %146 : vector<8x128xf32>
    %148 = math.exp %147 : vector<8x128xf32>
    %cst_50 = arith.constant 1.000000e+00 : f32
    %149 = vector.broadcast %cst_50 : f32 to vector<8x128xf32>
    %150 = arith.addf %149, %148 : vector<8x128xf32>
    %151 = arith.divf %149, %150 : vector<8x128xf32>
    %152 = math.tanh %146 : vector<8x128xf32>
    %153 = vector.extract_strided_slice %151 {offsets = [0, 0], sizes = [8, 32], strides = [1, 1]} : vector<8x128xf32> to vector<8x32xf32>
    %154 = vector.extract_strided_slice %151 {offsets = [0, 32], sizes = [8, 32], strides = [1, 1]} : vector<8x128xf32> to vector<8x32xf32>
    %155 = vector.extract_strided_slice %152 {offsets = [0, 64], sizes = [8, 32], strides = [1, 1]} : vector<8x128xf32> to vector<8x32xf32>
    %156 = vector.extract_strided_slice %151 {offsets = [0, 96], sizes = [8, 32], strides = [1, 1]} : vector<8x128xf32> to vector<8x32xf32>
    %157 = arith.mulf %154, %119 : vector<8x32xf32>
    %158 = arith.mulf %153, %155 : vector<8x32xf32>
    %159 = arith.addf %157, %158 : vector<8x32xf32>
    %160 = math.tanh %159 : vector<8x32xf32>
    %161 = arith.mulf %156, %160 : vector<8x32xf32>
    %162 = vector.extract_strided_slice %26 {offsets = [24, 0], sizes = [8, 128], strides = [1, 1]} : vector<48x128xf32> to vector<8x128xf32>
    %163 = arith.truncf %140 : vector<8x32xf32> to vector<8x32xbf16>
    %cst_51 = arith.constant dense<0.000000e+00> : vector<8x128xf32>
    %164 = tpu.matmul %163, %0, %cst_51 {dimension_numbers = #tpu.dot_dimension_numbers<[1], [0], [0], [1], [0, 0, 1, 1], [], []>} : vector<8x32xbf16>, vector<32x128xbf16>, vector<8x128xf32> -> vector<8x128xf32>
    %165 = arith.addf %162, %164 : vector<8x128xf32>
    %166 = arith.negf %165 : vector<8x128xf32>
    %167 = math.exp %166 : vector<8x128xf32>
    %cst_52 = arith.constant 1.000000e+00 : f32
    %168 = vector.broadcast %cst_52 : f32 to vector<8x128xf32>
    %169 = arith.addf %168, %167 : vector<8x128xf32>
    %170 = arith.divf %168, %169 : vector<8x128xf32>
    %171 = math.tanh %165 : vector<8x128xf32>
    %172 = vector.extract_strided_slice %170 {offsets = [0, 0], sizes = [8, 32], strides = [1, 1]} : vector<8x128xf32> to vector<8x32xf32>
    %173 = vector.extract_strided_slice %170 {offsets = [0, 32], sizes = [8, 32], strides = [1, 1]} : vector<8x128xf32> to vector<8x32xf32>
    %174 = vector.extract_strided_slice %171 {offsets = [0, 64], sizes = [8, 32], strides = [1, 1]} : vector<8x128xf32> to vector<8x32xf32>
    %175 = vector.extract_strided_slice %170 {offsets = [0, 96], sizes = [8, 32], strides = [1, 1]} : vector<8x128xf32> to vector<8x32xf32>
    %176 = arith.mulf %173, %138 : vector<8x32xf32>
    %177 = arith.mulf %172, %174 : vector<8x32xf32>
    %178 = arith.addf %176, %177 : vector<8x32xf32>
    %179 = math.tanh %178 : vector<8x32xf32>
    %180 = arith.mulf %175, %179 : vector<8x32xf32>
    %181 = arith.truncf %161 : vector<8x32xf32> to vector<8x32xbf16>
    %cst_53 = arith.constant dense<0.000000e+00> : vector<8x128xf32>
    %182 = tpu.matmul %181, %1, %cst_53 {dimension_numbers = #tpu.dot_dimension_numbers<[1], [0], [0], [1], [0, 0, 1, 1], [], []>} : vector<8x32xbf16>, vector<32x128xbf16>, vector<8x128xf32> -> vector<8x128xf32>
    %183 = arith.truncf %180 : vector<8x32xf32> to vector<8x32xbf16>
    %cst_54 = arith.constant dense<0.000000e+00> : vector<8x128xf32>
    %184 = tpu.matmul %183, %4, %cst_54 {dimension_numbers = #tpu.dot_dimension_numbers<[1], [0], [0], [1], [0, 0, 1, 1], [], []>} : vector<8x32xbf16>, vector<32x128xbf16>, vector<8x128xf32> -> vector<8x128xf32>
    %185 = arith.addf %11, %184 : vector<8x128xf32>
    %186 = arith.addf %185, %182 : vector<8x128xf32>
    %187 = arith.negf %186 : vector<8x128xf32>
    %188 = math.exp %187 : vector<8x128xf32>
    %cst_55 = arith.constant 1.000000e+00 : f32
    %189 = vector.broadcast %cst_55 : f32 to vector<8x128xf32>
    %190 = arith.addf %189, %188 : vector<8x128xf32>
    %191 = arith.divf %189, %190 : vector<8x128xf32>
    %192 = math.tanh %186 : vector<8x128xf32>
    %193 = vector.extract_strided_slice %191 {offsets = [0, 0], sizes = [8, 32], strides = [1, 1]} : vector<8x128xf32> to vector<8x32xf32>
    %194 = vector.extract_strided_slice %191 {offsets = [0, 32], sizes = [8, 32], strides = [1, 1]} : vector<8x128xf32> to vector<8x32xf32>
    %195 = vector.extract_strided_slice %192 {offsets = [0, 64], sizes = [8, 32], strides = [1, 1]} : vector<8x128xf32> to vector<8x32xf32>
    %196 = vector.extract_strided_slice %191 {offsets = [0, 96], sizes = [8, 32], strides = [1, 1]} : vector<8x128xf32> to vector<8x32xf32>
    %197 = arith.mulf %194, %159 : vector<8x32xf32>
    %198 = arith.mulf %193, %195 : vector<8x32xf32>
    %199 = arith.addf %197, %198 : vector<8x32xf32>
    %200 = math.tanh %199 : vector<8x32xf32>
    %201 = arith.mulf %196, %200 : vector<8x32xf32>
    %202 = vector.extract_strided_slice %26 {offsets = [32, 0], sizes = [8, 128], strides = [1, 1]} : vector<48x128xf32> to vector<8x128xf32>
    %203 = arith.truncf %180 : vector<8x32xf32> to vector<8x32xbf16>
    %cst_56 = arith.constant dense<0.000000e+00> : vector<8x128xf32>
    %204 = tpu.matmul %203, %0, %cst_56 {dimension_numbers = #tpu.dot_dimension_numbers<[1], [0], [0], [1], [0, 0, 1, 1], [], []>} : vector<8x32xbf16>, vector<32x128xbf16>, vector<8x128xf32> -> vector<8x128xf32>
    %205 = arith.addf %202, %204 : vector<8x128xf32>
    %206 = arith.negf %205 : vector<8x128xf32>
    %207 = math.exp %206 : vector<8x128xf32>
    %cst_57 = arith.constant 1.000000e+00 : f32
    %208 = vector.broadcast %cst_57 : f32 to vector<8x128xf32>
    %209 = arith.addf %208, %207 : vector<8x128xf32>
    %210 = arith.divf %208, %209 : vector<8x128xf32>
    %211 = math.tanh %205 : vector<8x128xf32>
    %212 = vector.extract_strided_slice %210 {offsets = [0, 0], sizes = [8, 32], strides = [1, 1]} : vector<8x128xf32> to vector<8x32xf32>
    %213 = vector.extract_strided_slice %210 {offsets = [0, 32], sizes = [8, 32], strides = [1, 1]} : vector<8x128xf32> to vector<8x32xf32>
    %214 = vector.extract_strided_slice %211 {offsets = [0, 64], sizes = [8, 32], strides = [1, 1]} : vector<8x128xf32> to vector<8x32xf32>
    %215 = vector.extract_strided_slice %210 {offsets = [0, 96], sizes = [8, 32], strides = [1, 1]} : vector<8x128xf32> to vector<8x32xf32>
    %216 = arith.mulf %213, %178 : vector<8x32xf32>
    %217 = arith.mulf %212, %214 : vector<8x32xf32>
    %218 = arith.addf %216, %217 : vector<8x32xf32>
    %219 = math.tanh %218 : vector<8x32xf32>
    %220 = arith.mulf %215, %219 : vector<8x32xf32>
    %221 = arith.truncf %201 : vector<8x32xf32> to vector<8x32xbf16>
    %cst_58 = arith.constant dense<0.000000e+00> : vector<8x128xf32>
    %222 = tpu.matmul %221, %1, %cst_58 {dimension_numbers = #tpu.dot_dimension_numbers<[1], [0], [0], [1], [0, 0, 1, 1], [], []>} : vector<8x32xbf16>, vector<32x128xbf16>, vector<8x128xf32> -> vector<8x128xf32>
    %223 = arith.truncf %220 : vector<8x32xf32> to vector<8x32xbf16>
    %cst_59 = arith.constant dense<0.000000e+00> : vector<8x128xf32>
    %224 = tpu.matmul %223, %4, %cst_59 {dimension_numbers = #tpu.dot_dimension_numbers<[1], [0], [0], [1], [0, 0, 1, 1], [], []>} : vector<8x32xbf16>, vector<32x128xbf16>, vector<8x128xf32> -> vector<8x128xf32>
    %225 = arith.addf %11, %224 : vector<8x128xf32>
    %226 = arith.addf %225, %222 : vector<8x128xf32>
    %227 = arith.negf %226 : vector<8x128xf32>
    %228 = math.exp %227 : vector<8x128xf32>
    %cst_60 = arith.constant 1.000000e+00 : f32
    %229 = vector.broadcast %cst_60 : f32 to vector<8x128xf32>
    %230 = arith.addf %229, %228 : vector<8x128xf32>
    %231 = arith.divf %229, %230 : vector<8x128xf32>
    %232 = math.tanh %226 : vector<8x128xf32>
    %233 = vector.extract_strided_slice %231 {offsets = [0, 0], sizes = [8, 32], strides = [1, 1]} : vector<8x128xf32> to vector<8x32xf32>
    %234 = vector.extract_strided_slice %231 {offsets = [0, 32], sizes = [8, 32], strides = [1, 1]} : vector<8x128xf32> to vector<8x32xf32>
    %235 = vector.extract_strided_slice %232 {offsets = [0, 64], sizes = [8, 32], strides = [1, 1]} : vector<8x128xf32> to vector<8x32xf32>
    %236 = vector.extract_strided_slice %231 {offsets = [0, 96], sizes = [8, 32], strides = [1, 1]} : vector<8x128xf32> to vector<8x32xf32>
    %237 = arith.mulf %234, %199 : vector<8x32xf32>
    %238 = arith.mulf %233, %235 : vector<8x32xf32>
    %239 = arith.addf %237, %238 : vector<8x32xf32>
    %240 = math.tanh %239 : vector<8x32xf32>
    %241 = arith.mulf %236, %240 : vector<8x32xf32>
    %242 = vector.extract_strided_slice %26 {offsets = [40, 0], sizes = [8, 128], strides = [1, 1]} : vector<48x128xf32> to vector<8x128xf32>
    %243 = arith.truncf %220 : vector<8x32xf32> to vector<8x32xbf16>
    %cst_61 = arith.constant dense<0.000000e+00> : vector<8x128xf32>
    %244 = tpu.matmul %243, %0, %cst_61 {dimension_numbers = #tpu.dot_dimension_numbers<[1], [0], [0], [1], [0, 0, 1, 1], [], []>} : vector<8x32xbf16>, vector<32x128xbf16>, vector<8x128xf32> -> vector<8x128xf32>
    %245 = arith.addf %242, %244 : vector<8x128xf32>
    %246 = arith.negf %245 : vector<8x128xf32>
    %247 = math.exp %246 : vector<8x128xf32>
    %cst_62 = arith.constant 1.000000e+00 : f32
    %248 = vector.broadcast %cst_62 : f32 to vector<8x128xf32>
    %249 = arith.addf %248, %247 : vector<8x128xf32>
    %250 = arith.divf %248, %249 : vector<8x128xf32>
    %251 = math.tanh %245 : vector<8x128xf32>
    %252 = vector.extract_strided_slice %250 {offsets = [0, 0], sizes = [8, 32], strides = [1, 1]} : vector<8x128xf32> to vector<8x32xf32>
    %253 = vector.extract_strided_slice %250 {offsets = [0, 32], sizes = [8, 32], strides = [1, 1]} : vector<8x128xf32> to vector<8x32xf32>
    %254 = vector.extract_strided_slice %251 {offsets = [0, 64], sizes = [8, 32], strides = [1, 1]} : vector<8x128xf32> to vector<8x32xf32>
    %255 = vector.extract_strided_slice %250 {offsets = [0, 96], sizes = [8, 32], strides = [1, 1]} : vector<8x128xf32> to vector<8x32xf32>
    %256 = arith.mulf %253, %218 : vector<8x32xf32>
    %257 = arith.mulf %252, %254 : vector<8x32xf32>
    %258 = arith.addf %256, %257 : vector<8x32xf32>
    %259 = math.tanh %258 : vector<8x32xf32>
    %260 = arith.mulf %255, %259 : vector<8x32xf32>
    %261 = arith.truncf %241 : vector<8x32xf32> to vector<8x32xbf16>
    %cst_63 = arith.constant dense<0.000000e+00> : vector<8x128xf32>
    %262 = tpu.matmul %261, %1, %cst_63 {dimension_numbers = #tpu.dot_dimension_numbers<[1], [0], [0], [1], [0, 0, 1, 1], [], []>} : vector<8x32xbf16>, vector<32x128xbf16>, vector<8x128xf32> -> vector<8x128xf32>
    %263 = arith.truncf %260 : vector<8x32xf32> to vector<8x32xbf16>
    %cst_64 = arith.constant dense<0.000000e+00> : vector<8x128xf32>
    %264 = tpu.matmul %263, %4, %cst_64 {dimension_numbers = #tpu.dot_dimension_numbers<[1], [0], [0], [1], [0, 0, 1, 1], [], []>} : vector<8x32xbf16>, vector<32x128xbf16>, vector<8x128xf32> -> vector<8x128xf32>
    %265 = arith.addf %11, %264 : vector<8x128xf32>
    %266 = arith.addf %265, %262 : vector<8x128xf32>
    %267 = arith.negf %266 : vector<8x128xf32>
    %268 = math.exp %267 : vector<8x128xf32>
    %cst_65 = arith.constant 1.000000e+00 : f32
    %269 = vector.broadcast %cst_65 : f32 to vector<8x128xf32>
    %270 = arith.addf %269, %268 : vector<8x128xf32>
    %271 = arith.divf %269, %270 : vector<8x128xf32>
    %272 = math.tanh %266 : vector<8x128xf32>
    %273 = vector.extract_strided_slice %271 {offsets = [0, 0], sizes = [8, 32], strides = [1, 1]} : vector<8x128xf32> to vector<8x32xf32>
    %274 = vector.extract_strided_slice %271 {offsets = [0, 32], sizes = [8, 32], strides = [1, 1]} : vector<8x128xf32> to vector<8x32xf32>
    %275 = vector.extract_strided_slice %272 {offsets = [0, 64], sizes = [8, 32], strides = [1, 1]} : vector<8x128xf32> to vector<8x32xf32>
    %276 = vector.extract_strided_slice %271 {offsets = [0, 96], sizes = [8, 32], strides = [1, 1]} : vector<8x128xf32> to vector<8x32xf32>
    %277 = arith.mulf %274, %239 : vector<8x32xf32>
    %278 = arith.mulf %273, %275 : vector<8x32xf32>
    %279 = arith.addf %277, %278 : vector<8x32xf32>
    %280 = math.tanh %279 : vector<8x32xf32>
    %281 = arith.mulf %276, %280 : vector<8x32xf32>
    %cst_66 = arith.constant 0.000000e+00 : f32
    %282 = vector.broadcast %cst_66 : f32 to vector<8x128xf32>
    %c0_67 = arith.constant 0 : index
    %c0_68 = arith.constant 0 : index
    %c0_69 = arith.constant 0 : index
    %283 = vector.load %arg16[%c0_67, %c0_68, %c0_69] : memref<8x8x128xf32, #tpu.memory_space<vmem>>, vector<1x8x128xf32>
    %284 = vector.shape_cast %283 : vector<1x8x128xf32> to vector<8x128xf32>
    %285 = vector.shape_cast %282 : vector<8x128xf32> to vector<1x8x128xf32>
    tpu.vector_store %arg16[%c0_67, %c0_68, %c0_69], %285 {strides = array<i32>} : memref<8x8x128xf32, #tpu.memory_space<vmem>>, vector<1x8x128xf32>,
    %286 = arith.truncf %260 : vector<8x32xf32> to vector<8x32xbf16>
    %cst_70 = arith.constant dense<0.000000e+00> : vector<8x128xf32>
    %287 = tpu.matmul %286, %2, %cst_70 {dimension_numbers = #tpu.dot_dimension_numbers<[1], [0], [0], [1], [0, 0, 1, 1], [], []>} : vector<8x32xbf16>, vector<32x128xbf16>, vector<8x128xf32> -> vector<8x128xf32>
    %288 = arith.addf %37, %287 : vector<8x128xf32>
    %289 = arith.negf %288 : vector<8x128xf32>
    %290 = math.exp %289 : vector<8x128xf32>
    %cst_71 = arith.constant 1.000000e+00 : f32
    %291 = vector.broadcast %cst_71 : f32 to vector<8x128xf32>
    %292 = arith.addf %291, %290 : vector<8x128xf32>
    %293 = arith.divf %291, %292 : vector<8x128xf32>
    %294 = math.tanh %288 : vector<8x128xf32>
    %295 = vector.extract_strided_slice %293 {offsets = [0, 0], sizes = [8, 32], strides = [1, 1]} : vector<8x128xf32> to vector<8x32xf32>
    %296 = vector.extract_strided_slice %293 {offsets = [0, 32], sizes = [8, 32], strides = [1, 1]} : vector<8x128xf32> to vector<8x32xf32>
    %297 = vector.extract_strided_slice %294 {offsets = [0, 64], sizes = [8, 32], strides = [1, 1]} : vector<8x128xf32> to vector<8x32xf32>
    %298 = vector.extract_strided_slice %293 {offsets = [0, 96], sizes = [8, 32], strides = [1, 1]} : vector<8x128xf32> to vector<8x32xf32>
    %299 = arith.mulf %296, %258 : vector<8x32xf32>
    %300 = arith.mulf %295, %297 : vector<8x32xf32>
    %301 = arith.addf %299, %300 : vector<8x32xf32>
    %302 = math.tanh %301 : vector<8x32xf32>
    %303 = arith.mulf %298, %302 : vector<8x32xf32>
    %304 = arith.truncf %281 : vector<8x32xf32> to vector<8x32xbf16>
    %cst_72 = arith.constant dense<0.000000e+00> : vector<8x128xf32>
    %305 = tpu.matmul %304, %3, %cst_72 {dimension_numbers = #tpu.dot_dimension_numbers<[1], [0], [0], [1], [0, 0, 1, 1], [], []>} : vector<8x32xbf16>, vector<32x128xbf16>, vector<8x128xf32> -> vector<8x128xf32>
    %306 = arith.truncf %303 : vector<8x32xf32> to vector<8x32xbf16>
    %cst_73 = arith.constant dense<0.000000e+00> : vector<8x128xf32>
    %307 = tpu.matmul %306, %5, %cst_73 {dimension_numbers = #tpu.dot_dimension_numbers<[1], [0], [0], [1], [0, 0, 1, 1], [], []>} : vector<8x32xbf16>, vector<32x128xbf16>, vector<8x128xf32> -> vector<8x128xf32>
    %308 = arith.addf %13, %307 : vector<8x128xf32>
    %309 = arith.addf %308, %305 : vector<8x128xf32>
    %310 = arith.negf %309 : vector<8x128xf32>
    %311 = math.exp %310 : vector<8x128xf32>
    %cst_74 = arith.constant 1.000000e+00 : f32
    %312 = vector.broadcast %cst_74 : f32 to vector<8x128xf32>
    %313 = arith.addf %312, %311 : vector<8x128xf32>
    %314 = arith.divf %312, %313 : vector<8x128xf32>
    %315 = math.tanh %309 : vector<8x128xf32>
    %316 = vector.extract_strided_slice %314 {offsets = [0, 0], sizes = [8, 32], strides = [1, 1]} : vector<8x128xf32> to vector<8x32xf32>
    %317 = vector.extract_strided_slice %314 {offsets = [0, 32], sizes = [8, 32], strides = [1, 1]} : vector<8x128xf32> to vector<8x32xf32>
    %318 = vector.extract_strided_slice %315 {offsets = [0, 64], sizes = [8, 32], strides = [1, 1]} : vector<8x128xf32> to vector<8x32xf32>
    %319 = vector.extract_strided_slice %314 {offsets = [0, 96], sizes = [8, 32], strides = [1, 1]} : vector<8x128xf32> to vector<8x32xf32>
    %320 = arith.mulf %317, %279 : vector<8x32xf32>
    %321 = arith.mulf %316, %318 : vector<8x32xf32>
    %322 = arith.addf %320, %321 : vector<8x32xf32>
    %323 = math.tanh %322 : vector<8x32xf32>
    %324 = arith.mulf %319, %323 : vector<8x32xf32>
    %325 = arith.truncf %303 : vector<8x32xf32> to vector<8x32xbf16>
    %cst_75 = arith.constant dense<0.000000e+00> : vector<8x128xf32>
    %326 = tpu.matmul %325, %2, %cst_75 {dimension_numbers = #tpu.dot_dimension_numbers<[1], [0], [0], [1], [0, 0, 1, 1], [], []>} : vector<8x32xbf16>, vector<32x128xbf16>, vector<8x128xf32> -> vector<8x128xf32>
    %327 = arith.addf %37, %326 : vector<8x128xf32>
    %328 = arith.negf %327 : vector<8x128xf32>
    %329 = math.exp %328 : vector<8x128xf32>
    %cst_76 = arith.constant 1.000000e+00 : f32
    %330 = vector.broadcast %cst_76 : f32 to vector<8x128xf32>
    %331 = arith.addf %330, %329 : vector<8x128xf32>
    %332 = arith.divf %330, %331 : vector<8x128xf32>
    %333 = math.tanh %327 : vector<8x128xf32>
    %334 = vector.extract_strided_slice %332 {offsets = [0, 0], sizes = [8, 32], strides = [1, 1]} : vector<8x128xf32> to vector<8x32xf32>
    %335 = vector.extract_strided_slice %332 {offsets = [0, 32], sizes = [8, 32], strides = [1, 1]} : vector<8x128xf32> to vector<8x32xf32>
    %336 = vector.extract_strided_slice %333 {offsets = [0, 64], sizes = [8, 32], strides = [1, 1]} : vector<8x128xf32> to vector<8x32xf32>
    %337 = vector.extract_strided_slice %332 {offsets = [0, 96], sizes = [8, 32], strides = [1, 1]} : vector<8x128xf32> to vector<8x32xf32>
    %338 = arith.mulf %335, %301 : vector<8x32xf32>
    %339 = arith.mulf %334, %336 : vector<8x32xf32>
    %340 = arith.addf %338, %339 : vector<8x32xf32>
    %341 = math.tanh %340 : vector<8x32xf32>
    %342 = arith.mulf %337, %341 : vector<8x32xf32>
    %343 = arith.truncf %324 : vector<8x32xf32> to vector<8x32xbf16>
    %cst_77 = arith.constant dense<0.000000e+00> : vector<8x128xf32>
    %344 = tpu.matmul %343, %3, %cst_77 {dimension_numbers = #tpu.dot_dimension_numbers<[1], [0], [0], [1], [0, 0, 1, 1], [], []>} : vector<8x32xbf16>, vector<32x128xbf16>, vector<8x128xf32> -> vector<8x128xf32>
    %345 = arith.truncf %342 : vector<8x32xf32> to vector<8x32xbf16>
    %cst_78 = arith.constant dense<0.000000e+00> : vector<8x128xf32>
    %346 = tpu.matmul %345, %5, %cst_78 {dimension_numbers = #tpu.dot_dimension_numbers<[1], [0], [0], [1], [0, 0, 1, 1], [], []>} : vector<8x32xbf16>, vector<32x128xbf16>, vector<8x128xf32> -> vector<8x128xf32>
    %347 = arith.addf %13, %346 : vector<8x128xf32>
    %348 = arith.addf %347, %344 : vector<8x128xf32>
    %349 = arith.negf %348 : vector<8x128xf32>
    %350 = math.exp %349 : vector<8x128xf32>
    %cst_79 = arith.constant 1.000000e+00 : f32
    %351 = vector.broadcast %cst_79 : f32 to vector<8x128xf32>
    %352 = arith.addf %351, %350 : vector<8x128xf32>
    %353 = arith.divf %351, %352 : vector<8x128xf32>
    %354 = math.tanh %348 : vector<8x128xf32>
    %355 = vector.extract_strided_slice %353 {offsets = [0, 0], sizes = [8, 32], strides = [1, 1]} : vector<8x128xf32> to vector<8x32xf32>
    %356 = vector.extract_strided_slice %353 {offsets = [0, 32], sizes = [8, 32], strides = [1, 1]} : vector<8x128xf32> to vector<8x32xf32>
    %357 = vector.extract_strided_slice %354 {offsets = [0, 64], sizes = [8, 32], strides = [1, 1]} : vector<8x128xf32> to vector<8x32xf32>
    %358 = vector.extract_strided_slice %353 {offsets = [0, 96], sizes = [8, 32], strides = [1, 1]} : vector<8x128xf32> to vector<8x32xf32>
    %359 = arith.mulf %356, %322 : vector<8x32xf32>
    %360 = arith.mulf %355, %357 : vector<8x32xf32>
    %361 = arith.addf %359, %360 : vector<8x32xf32>
    %362 = math.tanh %361 : vector<8x32xf32>
    %363 = arith.mulf %358, %362 : vector<8x32xf32>
    %364 = arith.truncf %342 : vector<8x32xf32> to vector<8x32xbf16>
    %cst_80 = arith.constant dense<0.000000e+00> : vector<8x128xf32>
    %365 = tpu.matmul %364, %2, %cst_80 {dimension_numbers = #tpu.dot_dimension_numbers<[1], [0], [0], [1], [0, 0, 1, 1], [], []>} : vector<8x32xbf16>, vector<32x128xbf16>, vector<8x128xf32> -> vector<8x128xf32>
    %366 = arith.addf %37, %365 : vector<8x128xf32>
    %367 = arith.negf %366 : vector<8x128xf32>
    %368 = math.exp %367 : vector<8x128xf32>
    %cst_81 = arith.constant 1.000000e+00 : f32
    %369 = vector.broadcast %cst_81 : f32 to vector<8x128xf32>
    %370 = arith.addf %369, %368 : vector<8x128xf32>
    %371 = arith.divf %369, %370 : vector<8x128xf32>
    %372 = math.tanh %366 : vector<8x128xf32>
    %373 = vector.extract_strided_slice %371 {offsets = [0, 0], sizes = [8, 32], strides = [1, 1]} : vector<8x128xf32> to vector<8x32xf32>
    %374 = vector.extract_strided_slice %371 {offsets = [0, 32], sizes = [8, 32], strides = [1, 1]} : vector<8x128xf32> to vector<8x32xf32>
    %375 = vector.extract_strided_slice %372 {offsets = [0, 64], sizes = [8, 32], strides = [1, 1]} : vector<8x128xf32> to vector<8x32xf32>
    %376 = vector.extract_strided_slice %371 {offsets = [0, 96], sizes = [8, 32], strides = [1, 1]} : vector<8x128xf32> to vector<8x32xf32>
    %377 = arith.mulf %374, %340 : vector<8x32xf32>
    %378 = arith.mulf %373, %375 : vector<8x32xf32>
    %379 = arith.addf %377, %378 : vector<8x32xf32>
    %380 = math.tanh %379 : vector<8x32xf32>
    %381 = arith.mulf %376, %380 : vector<8x32xf32>
    %382 = arith.truncf %363 : vector<8x32xf32> to vector<8x32xbf16>
    %cst_82 = arith.constant dense<0.000000e+00> : vector<8x128xf32>
    %383 = tpu.matmul %382, %3, %cst_82 {dimension_numbers = #tpu.dot_dimension_numbers<[1], [0], [0], [1], [0, 0, 1, 1], [], []>} : vector<8x32xbf16>, vector<32x128xbf16>, vector<8x128xf32> -> vector<8x128xf32>
    %384 = arith.truncf %381 : vector<8x32xf32> to vector<8x32xbf16>
    %cst_83 = arith.constant dense<0.000000e+00> : vector<8x128xf32>
    %385 = tpu.matmul %384, %5, %cst_83 {dimension_numbers = #tpu.dot_dimension_numbers<[1], [0], [0], [1], [0, 0, 1, 1], [], []>} : vector<8x32xbf16>, vector<32x128xbf16>, vector<8x128xf32> -> vector<8x128xf32>
    %386 = arith.addf %13, %385 : vector<8x128xf32>
    %387 = arith.addf %386, %383 : vector<8x128xf32>
    %388 = arith.negf %387 : vector<8x128xf32>
    %389 = math.exp %388 : vector<8x128xf32>
    %cst_84 = arith.constant 1.000000e+00 : f32
    %390 = vector.broadcast %cst_84 : f32 to vector<8x128xf32>
    %391 = arith.addf %390, %389 : vector<8x128xf32>
    %392 = arith.divf %390, %391 : vector<8x128xf32>
    %393 = math.tanh %387 : vector<8x128xf32>
    %394 = vector.extract_strided_slice %392 {offsets = [0, 0], sizes = [8, 32], strides = [1, 1]} : vector<8x128xf32> to vector<8x32xf32>
    %395 = vector.extract_strided_slice %392 {offsets = [0, 32], sizes = [8, 32], strides = [1, 1]} : vector<8x128xf32> to vector<8x32xf32>
    %396 = vector.extract_strided_slice %393 {offsets = [0, 64], sizes = [8, 32], strides = [1, 1]} : vector<8x128xf32> to vector<8x32xf32>
    %397 = vector.extract_strided_slice %392 {offsets = [0, 96], sizes = [8, 32], strides = [1, 1]} : vector<8x128xf32> to vector<8x32xf32>
    %398 = arith.mulf %395, %361 : vector<8x32xf32>
    %399 = arith.mulf %394, %396 : vector<8x32xf32>
    %400 = arith.addf %398, %399 : vector<8x32xf32>
    %401 = math.tanh %400 : vector<8x32xf32>
    %402 = arith.mulf %397, %401 : vector<8x32xf32>
    %403 = arith.truncf %381 : vector<8x32xf32> to vector<8x32xbf16>
    %cst_85 = arith.constant dense<0.000000e+00> : vector<8x128xf32>
    %404 = tpu.matmul %403, %2, %cst_85 {dimension_numbers = #tpu.dot_dimension_numbers<[1], [0], [0], [1], [0, 0, 1, 1], [], []>} : vector<8x32xbf16>, vector<32x128xbf16>, vector<8x128xf32> -> vector<8x128xf32>
    %405 = arith.addf %37, %404 : vector<8x128xf32>
    %406 = arith.negf %405 : vector<8x128xf32>
    %407 = math.exp %406 : vector<8x128xf32>
    %cst_86 = arith.constant 1.000000e+00 : f32
    %408 = vector.broadcast %cst_86 : f32 to vector<8x128xf32>
    %409 = arith.addf %408, %407 : vector<8x128xf32>
    %410 = arith.divf %408, %409 : vector<8x128xf32>
    %411 = math.tanh %405 : vector<8x128xf32>
    %412 = vector.extract_strided_slice %410 {offsets = [0, 0], sizes = [8, 32], strides = [1, 1]} : vector<8x128xf32> to vector<8x32xf32>
    %413 = vector.extract_strided_slice %410 {offsets = [0, 32], sizes = [8, 32], strides = [1, 1]} : vector<8x128xf32> to vector<8x32xf32>
    %414 = vector.extract_strided_slice %411 {offsets = [0, 64], sizes = [8, 32], strides = [1, 1]} : vector<8x128xf32> to vector<8x32xf32>
    %415 = vector.extract_strided_slice %410 {offsets = [0, 96], sizes = [8, 32], strides = [1, 1]} : vector<8x128xf32> to vector<8x32xf32>
    %416 = arith.mulf %413, %379 : vector<8x32xf32>
    %417 = arith.mulf %412, %414 : vector<8x32xf32>
    %418 = arith.addf %416, %417 : vector<8x32xf32>
    %419 = math.tanh %418 : vector<8x32xf32>
    %420 = arith.mulf %415, %419 : vector<8x32xf32>
    %421 = arith.truncf %402 : vector<8x32xf32> to vector<8x32xbf16>
    %cst_87 = arith.constant dense<0.000000e+00> : vector<8x128xf32>
    %422 = tpu.matmul %421, %3, %cst_87 {dimension_numbers = #tpu.dot_dimension_numbers<[1], [0], [0], [1], [0, 0, 1, 1], [], []>} : vector<8x32xbf16>, vector<32x128xbf16>, vector<8x128xf32> -> vector<8x128xf32>
    %423 = arith.truncf %420 : vector<8x32xf32> to vector<8x32xbf16>
    %cst_88 = arith.constant dense<0.000000e+00> : vector<8x128xf32>
    %424 = tpu.matmul %423, %5, %cst_88 {dimension_numbers = #tpu.dot_dimension_numbers<[1], [0], [0], [1], [0, 0, 1, 1], [], []>} : vector<8x32xbf16>, vector<32x128xbf16>, vector<8x128xf32> -> vector<8x128xf32>
    %425 = arith.addf %13, %424 : vector<8x128xf32>
    %426 = arith.addf %425, %422 : vector<8x128xf32>
    %427 = arith.negf %426 : vector<8x128xf32>
    %428 = math.exp %427 : vector<8x128xf32>
    %cst_89 = arith.constant 1.000000e+00 : f32
    %429 = vector.broadcast %cst_89 : f32 to vector<8x128xf32>
    %430 = arith.addf %429, %428 : vector<8x128xf32>
    %431 = arith.divf %429, %430 : vector<8x128xf32>
    %432 = math.tanh %426 : vector<8x128xf32>
    %433 = vector.extract_strided_slice %431 {offsets = [0, 0], sizes = [8, 32], strides = [1, 1]} : vector<8x128xf32> to vector<8x32xf32>
    %434 = vector.extract_strided_slice %431 {offsets = [0, 32], sizes = [8, 32], strides = [1, 1]} : vector<8x128xf32> to vector<8x32xf32>
    %435 = vector.extract_strided_slice %432 {offsets = [0, 64], sizes = [8, 32], strides = [1, 1]} : vector<8x128xf32> to vector<8x32xf32>
    %436 = vector.extract_strided_slice %431 {offsets = [0, 96], sizes = [8, 32], strides = [1, 1]} : vector<8x128xf32> to vector<8x32xf32>
    %437 = arith.mulf %434, %400 : vector<8x32xf32>
    %438 = arith.mulf %433, %435 : vector<8x32xf32>
    %439 = arith.addf %437, %438 : vector<8x32xf32>
    %440 = math.tanh %439 : vector<8x32xf32>
    %441 = arith.mulf %436, %440 : vector<8x32xf32>
    %442 = arith.truncf %420 : vector<8x32xf32> to vector<8x32xbf16>
    %cst_90 = arith.constant dense<0.000000e+00> : vector<8x128xf32>
    %443 = tpu.matmul %442, %2, %cst_90 {dimension_numbers = #tpu.dot_dimension_numbers<[1], [0], [0], [1], [0, 0, 1, 1], [], []>} : vector<8x32xbf16>, vector<32x128xbf16>, vector<8x128xf32> -> vector<8x128xf32>
    %444 = arith.addf %37, %443 : vector<8x128xf32>
    %445 = arith.negf %444 : vector<8x128xf32>
    %446 = math.exp %445 : vector<8x128xf32>
    %cst_91 = arith.constant 1.000000e+00 : f32
    %447 = vector.broadcast %cst_91 : f32 to vector<8x128xf32>
    %448 = arith.addf %447, %446 : vector<8x128xf32>
    %449 = arith.divf %447, %448 : vector<8x128xf32>
    %450 = math.tanh %444 : vector<8x128xf32>
    %451 = vector.extract_strided_slice %449 {offsets = [0, 0], sizes = [8, 32], strides = [1, 1]} : vector<8x128xf32> to vector<8x32xf32>
    %452 = vector.extract_strided_slice %449 {offsets = [0, 32], sizes = [8, 32], strides = [1, 1]} : vector<8x128xf32> to vector<8x32xf32>
    %453 = vector.extract_strided_slice %450 {offsets = [0, 64], sizes = [8, 32], strides = [1, 1]} : vector<8x128xf32> to vector<8x32xf32>
    %454 = vector.extract_strided_slice %449 {offsets = [0, 96], sizes = [8, 32], strides = [1, 1]} : vector<8x128xf32> to vector<8x32xf32>
    %455 = arith.mulf %452, %418 : vector<8x32xf32>
    %456 = arith.mulf %451, %453 : vector<8x32xf32>
    %457 = arith.addf %455, %456 : vector<8x32xf32>
    %458 = math.tanh %457 : vector<8x32xf32>
    %459 = arith.mulf %454, %458 : vector<8x32xf32>
    %460 = arith.truncf %441 : vector<8x32xf32> to vector<8x32xbf16>
    %cst_92 = arith.constant dense<0.000000e+00> : vector<8x128xf32>
    %461 = tpu.matmul %460, %3, %cst_92 {dimension_numbers = #tpu.dot_dimension_numbers<[1], [0], [0], [1], [0, 0, 1, 1], [], []>} : vector<8x32xbf16>, vector<32x128xbf16>, vector<8x128xf32> -> vector<8x128xf32>
    %462 = arith.truncf %459 : vector<8x32xf32> to vector<8x32xbf16>
    %cst_93 = arith.constant dense<0.000000e+00> : vector<8x128xf32>
    %463 = tpu.matmul %462, %5, %cst_93 {dimension_numbers = #tpu.dot_dimension_numbers<[1], [0], [0], [1], [0, 0, 1, 1], [], []>} : vector<8x32xbf16>, vector<32x128xbf16>, vector<8x128xf32> -> vector<8x128xf32>
    %464 = arith.addf %13, %463 : vector<8x128xf32>
    %465 = arith.addf %464, %461 : vector<8x128xf32>
    %466 = arith.negf %465 : vector<8x128xf32>
    %467 = math.exp %466 : vector<8x128xf32>
    %cst_94 = arith.constant 1.000000e+00 : f32
    %468 = vector.broadcast %cst_94 : f32 to vector<8x128xf32>
    %469 = arith.addf %468, %467 : vector<8x128xf32>
    %470 = arith.divf %468, %469 : vector<8x128xf32>
    %471 = math.tanh %465 : vector<8x128xf32>
    %472 = vector.extract_strided_slice %470 {offsets = [0, 0], sizes = [8, 32], strides = [1, 1]} : vector<8x128xf32> to vector<8x32xf32>
    %473 = vector.extract_strided_slice %470 {offsets = [0, 32], sizes = [8, 32], strides = [1, 1]} : vector<8x128xf32> to vector<8x32xf32>
    %474 = vector.extract_strided_slice %471 {offsets = [0, 64], sizes = [8, 32], strides = [1, 1]} : vector<8x128xf32> to vector<8x32xf32>
    %475 = vector.extract_strided_slice %470 {offsets = [0, 96], sizes = [8, 32], strides = [1, 1]} : vector<8x128xf32> to vector<8x32xf32>
    %476 = arith.mulf %473, %439 : vector<8x32xf32>
    %477 = arith.mulf %472, %474 : vector<8x32xf32>
    %478 = arith.addf %476, %477 : vector<8x32xf32>
    %479 = math.tanh %478 : vector<8x32xf32>
    %480 = arith.mulf %475, %479 : vector<8x32xf32>
    %481 = arith.truncf %459 : vector<8x32xf32> to vector<8x32xbf16>
    %cst_95 = arith.constant dense<0.000000e+00> : vector<8x128xf32>
    %482 = tpu.matmul %481, %2, %cst_95 {dimension_numbers = #tpu.dot_dimension_numbers<[1], [0], [0], [1], [0, 0, 1, 1], [], []>} : vector<8x32xbf16>, vector<32x128xbf16>, vector<8x128xf32> -> vector<8x128xf32>
    %483 = arith.addf %37, %482 : vector<8x128xf32>
    %484 = arith.negf %483 : vector<8x128xf32>
    %485 = math.exp %484 : vector<8x128xf32>
    %cst_96 = arith.constant 1.000000e+00 : f32
    %486 = vector.broadcast %cst_96 : f32 to vector<8x128xf32>
    %487 = arith.addf %486, %485 : vector<8x128xf32>
    %488 = arith.divf %486, %487 : vector<8x128xf32>
    %489 = math.tanh %483 : vector<8x128xf32>
    %490 = vector.extract_strided_slice %488 {offsets = [0, 0], sizes = [8, 32], strides = [1, 1]} : vector<8x128xf32> to vector<8x32xf32>
    %491 = vector.extract_strided_slice %488 {offsets = [0, 32], sizes = [8, 32], strides = [1, 1]} : vector<8x128xf32> to vector<8x32xf32>
    %492 = vector.extract_strided_slice %489 {offsets = [0, 64], sizes = [8, 32], strides = [1, 1]} : vector<8x128xf32> to vector<8x32xf32>
    %493 = vector.extract_strided_slice %488 {offsets = [0, 96], sizes = [8, 32], strides = [1, 1]} : vector<8x128xf32> to vector<8x32xf32>
    %494 = arith.mulf %491, %457 : vector<8x32xf32>
    %495 = arith.mulf %490, %492 : vector<8x32xf32>
    %496 = arith.addf %494, %495 : vector<8x32xf32>
    %497 = math.tanh %496 : vector<8x32xf32>
    %498 = arith.mulf %493, %497 : vector<8x32xf32>
    %499 = arith.truncf %480 : vector<8x32xf32> to vector<8x32xbf16>
    %cst_97 = arith.constant dense<0.000000e+00> : vector<8x128xf32>
    %500 = tpu.matmul %499, %3, %cst_97 {dimension_numbers = #tpu.dot_dimension_numbers<[1], [0], [0], [1], [0, 0, 1, 1], [], []>} : vector<8x32xbf16>, vector<32x128xbf16>, vector<8x128xf32> -> vector<8x128xf32>
    %501 = arith.truncf %498 : vector<8x32xf32> to vector<8x32xbf16>
    %cst_98 = arith.constant dense<0.000000e+00> : vector<8x128xf32>
    %502 = tpu.matmul %501, %5, %cst_98 {dimension_numbers = #tpu.dot_dimension_numbers<[1], [0], [0], [1], [0, 0, 1, 1], [], []>} : vector<8x32xbf16>, vector<32x128xbf16>, vector<8x128xf32> -> vector<8x128xf32>
    %503 = arith.addf %13, %502 : vector<8x128xf32>
    %504 = arith.addf %503, %500 : vector<8x128xf32>
    %505 = arith.negf %504 : vector<8x128xf32>
    %506 = math.exp %505 : vector<8x128xf32>
    %cst_99 = arith.constant 1.000000e+00 : f32
    %507 = vector.broadcast %cst_99 : f32 to vector<8x128xf32>
    %508 = arith.addf %507, %506 : vector<8x128xf32>
    %509 = arith.divf %507, %508 : vector<8x128xf32>
    %510 = math.tanh %504 : vector<8x128xf32>
    %511 = vector.extract_strided_slice %509 {offsets = [0, 0], sizes = [8, 32], strides = [1, 1]} : vector<8x128xf32> to vector<8x32xf32>
    %512 = vector.extract_strided_slice %509 {offsets = [0, 32], sizes = [8, 32], strides = [1, 1]} : vector<8x128xf32> to vector<8x32xf32>
    %513 = vector.extract_strided_slice %510 {offsets = [0, 64], sizes = [8, 32], strides = [1, 1]} : vector<8x128xf32> to vector<8x32xf32>
    %514 = vector.extract_strided_slice %509 {offsets = [0, 96], sizes = [8, 32], strides = [1, 1]} : vector<8x128xf32> to vector<8x32xf32>
    %515 = arith.mulf %512, %478 : vector<8x32xf32>
    %516 = arith.mulf %511, %513 : vector<8x32xf32>
    %517 = arith.addf %515, %516 : vector<8x32xf32>
    %518 = math.tanh %517 : vector<8x32xf32>
    %519 = arith.mulf %514, %518 : vector<8x32xf32>
    %520 = arith.truncf %498 : vector<8x32xf32> to vector<8x32xbf16>
    %cst_100 = arith.constant dense<0.000000e+00> : vector<8x128xf32>
    %521 = tpu.matmul %520, %2, %cst_100 {dimension_numbers = #tpu.dot_dimension_numbers<[1], [0], [0], [1], [0, 0, 1, 1], [], []>} : vector<8x32xbf16>, vector<32x128xbf16>, vector<8x128xf32> -> vector<8x128xf32>
    %522 = arith.addf %37, %521 : vector<8x128xf32>
    %523 = arith.negf %522 : vector<8x128xf32>
    %524 = math.exp %523 : vector<8x128xf32>
    %cst_101 = arith.constant 1.000000e+00 : f32
    %525 = vector.broadcast %cst_101 : f32 to vector<8x128xf32>
    %526 = arith.addf %525, %524 : vector<8x128xf32>
    %527 = arith.divf %525, %526 : vector<8x128xf32>
    %528 = math.tanh %522 : vector<8x128xf32>
    %529 = vector.extract_strided_slice %527 {offsets = [0, 0], sizes = [8, 32], strides = [1, 1]} : vector<8x128xf32> to vector<8x32xf32>
    %530 = vector.extract_strided_slice %527 {offsets = [0, 32], sizes = [8, 32], strides = [1, 1]} : vector<8x128xf32> to vector<8x32xf32>
    %531 = vector.extract_strided_slice %528 {offsets = [0, 64], sizes = [8, 32], strides = [1, 1]} : vector<8x128xf32> to vector<8x32xf32>
    %532 = vector.extract_strided_slice %527 {offsets = [0, 96], sizes = [8, 32], strides = [1, 1]} : vector<8x128xf32> to vector<8x32xf32>
    %533 = arith.mulf %530, %496 : vector<8x32xf32>
    %534 = arith.mulf %529, %531 : vector<8x32xf32>
    %535 = arith.addf %533, %534 : vector<8x32xf32>
    %536 = math.tanh %535 : vector<8x32xf32>
    %537 = arith.mulf %532, %536 : vector<8x32xf32>
    %538 = arith.truncf %519 : vector<8x32xf32> to vector<8x32xbf16>
    %cst_102 = arith.constant dense<0.000000e+00> : vector<8x128xf32>
    %539 = tpu.matmul %538, %3, %cst_102 {dimension_numbers = #tpu.dot_dimension_numbers<[1], [0], [0], [1], [0, 0, 1, 1], [], []>} : vector<8x32xbf16>, vector<32x128xbf16>, vector<8x128xf32> -> vector<8x128xf32>
    %540 = arith.truncf %537 : vector<8x32xf32> to vector<8x32xbf16>
    %cst_103 = arith.constant dense<0.000000e+00> : vector<8x128xf32>
    %541 = tpu.matmul %540, %5, %cst_103 {dimension_numbers = #tpu.dot_dimension_numbers<[1], [0], [0], [1], [0, 0, 1, 1], [], []>} : vector<8x32xbf16>, vector<32x128xbf16>, vector<8x128xf32> -> vector<8x128xf32>
    %542 = arith.addf %13, %541 : vector<8x128xf32>
    %543 = arith.addf %542, %539 : vector<8x128xf32>
    %544 = arith.negf %543 : vector<8x128xf32>
    %545 = math.exp %544 : vector<8x128xf32>
    %cst_104 = arith.constant 1.000000e+00 : f32
    %546 = vector.broadcast %cst_104 : f32 to vector<8x128xf32>
    %547 = arith.addf %546, %545 : vector<8x128xf32>
    %548 = arith.divf %546, %547 : vector<8x128xf32>
    %549 = math.tanh %543 : vector<8x128xf32>
    %550 = vector.extract_strided_slice %548 {offsets = [0, 0], sizes = [8, 32], strides = [1, 1]} : vector<8x128xf32> to vector<8x32xf32>
    %551 = vector.extract_strided_slice %548 {offsets = [0, 32], sizes = [8, 32], strides = [1, 1]} : vector<8x128xf32> to vector<8x32xf32>
    %552 = vector.extract_strided_slice %549 {offsets = [0, 64], sizes = [8, 32], strides = [1, 1]} : vector<8x128xf32> to vector<8x32xf32>
    %553 = vector.extract_strided_slice %548 {offsets = [0, 96], sizes = [8, 32], strides = [1, 1]} : vector<8x128xf32> to vector<8x32xf32>
    %554 = arith.mulf %551, %517 : vector<8x32xf32>
    %555 = arith.mulf %550, %552 : vector<8x32xf32>
    %556 = arith.addf %554, %555 : vector<8x32xf32>
    %557 = math.tanh %556 : vector<8x32xf32>
    %558 = arith.mulf %553, %557 : vector<8x32xf32>
    %559 = tpu.concatenate %324, %363, %402, %441, %480, %519, %558 in 0 : vector<8x32xf32>, vector<8x32xf32>, vector<8x32xf32>, vector<8x32xf32>, vector<8x32xf32>, vector<8x32xf32>, vector<8x32xf32> -> vector<56x32xf32>
    %560 = arith.truncf %559 : vector<56x32xf32> to vector<56x32xbf16>
    %cst_105 = arith.constant dense<0.000000e+00> : vector<56x128xf32>
    %561 = tpu.matmul %560, %14, %cst_105 {dimension_numbers = #tpu.dot_dimension_numbers<[1], [0], [0], [1], [0, 0, 1, 1], [], []>} : vector<56x32xbf16>, vector<32x128xbf16>, vector<56x128xf32> -> vector<56x128xf32>
    %562 = vector.broadcast %15 : vector<1x128xf32> to vector<56x128xf32>
    %563 = arith.addf %561, %562 : vector<56x128xf32>
    %564 = vector.shape_cast %563 : vector<56x128xf32> to vector<7x8x128xf32>
    %c1 = arith.constant 1 : index
    %c0_106 = arith.constant 0 : index
    %c0_107 = arith.constant 0 : index
    %565 = vector.load %arg16[%c1, %c0_106, %c0_107] : memref<8x8x128xf32, #tpu.memory_space<vmem>>, vector<7x8x128xf32>
    tpu.vector_store %arg16[%c1, %c0_106, %c0_107], %564 {strides = array<i32>} : memref<8x8x128xf32, #tpu.memory_space<vmem>>, vector<7x8x128xf32>,
    return
  }
}

</mosaic_0001>

<bundles_post_ra>
// kernel: tpu_custom_call.1
= control target key start
LH: loop header
LB: loop body
LE: loop exit
PB: predicated region body
PF: predicated region fallthrough
CT: control target
= control target key end

     0   :  { %s4759_s0 = inlined_call_operand.vmem [shape: s32[48,1], index: 0, kind: input, shape index: {}]   ;;  %s4760_s1 = inlined_call_operand.vmem [shape: s32[8,1], index: 1, kind: input, shape index: {}]   ;;  %s4761_s2 = inlined_call_operand.hbm [shape: bf16[16,128], index: 2, kind: input, shape index: {}]   ;;  %s4762_s3 = inlined_call_operand.hbm [shape: bf16[16,128], index: 3, kind: input, shape index: {}]   ;;  %s4763_s4 = inlined_call_operand.vmem [shape: bf16[32,128], index: 4, kind: input, shape index: {}]   ;;  %s4764_s5 = inlined_call_operand.vmem [shape: bf16[32,128], index: 5, kind: input, shape index: {}]   ;;  %s4765_s6 = inlined_call_operand.vmem [shape: bf16[32,128], index: 6, kind: input, shape index: {}]   ;;  %s4766_s7 = inlined_call_operand.vmem [shape: f32[1,128], index: 7, kind: input, shape index: {}]   ;;  %s4767_s8 = inlined_call_operand.vmem [shape: f32[1,128], index: 8, kind: input, shape index: {}]   ;;  %s4768_s9 = inlined_call_operand.vmem [shape: bf16[32,128], index: 9, kind: input, shape index: {}]   ;;  %s4769_s10 = inlined_call_operand.vmem [shape: bf16[32,128], index: 10, kind: input, shape index: {}]   ;;  %s4770_s11 = inlined_call_operand.vmem [shape: bf16[32,128], index: 11, kind: input, shape index: {}]   ;;  %s4771_s12 = inlined_call_operand.vmem [shape: f32[1,128], index: 12, kind: input, shape index: {}]   ;;  %s4772_s13 = inlined_call_operand.vmem [shape: f32[1,128], index: 13, kind: input, shape index: {}]   ;;  %s4773_s14 = inlined_call_operand.hbm [shape: bf16[32,128], index: 14, kind: input, shape index: {}]   ;;  %s4774_s15 = inlined_call_operand.vmem [shape: f32[1,128], index: 15, kind: input, shape index: {}]   ;;  %s4775_s16 = inlined_call_operand.hbm [shape: f32[8,8,128], index: 16, kind: output, shape index: {}]  }
   0x1   :  { %4777 = sst [smem:[#allocation12_spill]] %s4759_s0 }
   0x2   :  { %21 = vsyncpa [#allocation3], 0 }
   0x3   :  { %22 = vsyncpa [#allocation6], 0 }
   0x4   :  { %23 = vsyncpa [#allocation4], 0  ;;  %s3916_s21 = smov [#allocation5]   ;;  %s3917_s23 = smov [#allocation2]  }
   0x5   :  { %s45_s22 = sshll.u32 %s3916_s21, 4  ;;  %s33_s24 = sshll.u32 %s3917_s23, 4  ;;  %s46_s22 = int_to_ptr.vmem [resolvable:$true] %s45_s22  ;;  %s4013_s24 = int_to_ptr.vmem [resolvable:$true] %s33_s24 }
   0x6   :  { %s3822_s27 = scalar_lea.hbm %s4762_s3, 128 }
   0x7   :  { %p3823_p0 = scmp.ne.s32.totalorder %s4762_s3, %s3822_s27  ;;  %p3826_p1 = scmp.lt.u32.totalorder %s3822_s27, %s4762_s3 }
   0x9   :  { %p3828_p2 = pnand %p3826_p1, %p3823_p0 }
   0xb   :  { %3831 = shalt.err (!%p3828_p2)
}
   0xc   :  { %s3832_s17 = scalar_lea.vmem %s46_s22, 128  ;;  %p3837_p4 = scmp.lt.s32.totalorder %s46_s22, %s46_s22 }
   0xd   :  { %p3833_p3 = scmp.ne.s32.totalorder %s46_s22, %s3832_s17  ;;  %p3838_p5 = scmp.lt.s32.totalorder %s3832_s17, %s3832_s17 }
   0xf   :  { %p3839_p6 = por %p3838_p5, %p3837_p4 }
  0x11   :  { %p3840_p7 = pnand %p3839_p6, %p3833_p3 }
  0x13   :  { %3843 = shalt.err (!%p3840_p7)
}
  0x14   :  { %s3918_s18 = smov 64   ;;  %s3919_s19 = smov 4  }
  0x15   :  { %51 = dma.hbm_to_vmem [thread:$0]  %s4762_s3, 128, %s46_s22, [#allocation6], %s3918_s18, %s3918_s18, %s3919_s19  }
  0x16   :  { %s3844_s26 = scalar_lea.hbm %s4761_s2, 128 }
  0x17   :  { %p3845_p8 = scmp.ne.s32.totalorder %s4761_s2, %s3844_s26  ;;  %p3848_p9 = scmp.lt.u32.totalorder %s3844_s26, %s4761_s2 }
  0x19   :  { %p3850_p10 = pnand %p3848_p9, %p3845_p8 }
  0x1b   :  { %3853 = shalt.err (!%p3850_p10)
}
  0x1c   :  { %s3854_s0 = scalar_lea.vmem %s4013_s24, 128  ;;  %p3859_p12 = scmp.lt.s32.totalorder %s4013_s24, %s4013_s24 }
  0x1d   :  { %p3855_p11 = scmp.ne.s32.totalorder %s4013_s24, %s3854_s0  ;;  %p3860_p13 = scmp.lt.s32.totalorder %s3854_s0, %s3854_s0 }
  0x1f   :  { %p3861_p0 = por %p3860_p13, %p3859_p12 }
  0x21   :  { %p3862_p1 = pnand %p3861_p0, %p3855_p11 }
  0x23   :  { %3865 = shalt.err (!%p3862_p1)
}
  0x24   :  { %39 = dma.hbm_to_vmem [thread:$0]  %s4761_s2, 128, %s4013_s24, [#allocation3], %s3918_s18, %s3918_s18, %s3919_s19  }
  0x25   :  { %s3920_s17 = smov [#allocation7]   ;;  %s3866_s25 = scalar_lea.hbm %s4773_s14, 256 }
  0x26   :  { %s77_s20 = sshll.u32 %s3920_s17, 4  ;;  %p3867_p2 = scmp.ne.s32.totalorder %s4773_s14, %s3866_s25  ;;  %s78_s20 = int_to_ptr.vmem [resolvable:$true] %s77_s20 }
  0x27   :  { %p3870_p3 = scmp.lt.u32.totalorder %s3866_s25, %s4773_s14 }
  0x29   :  { %p3872_p4 = pnand %p3870_p3, %p3867_p2 }
  0x2b   :  { %3875 = shalt.err (!%p3872_p4)
}
  0x2c   :  { %s3876_s30 = scalar_lea.vmem %s78_s20, 256  ;;  %p3881_p6 = scmp.lt.s32.totalorder %s78_s20, %s78_s20 }
  0x2d   :  { %p3877_p5 = scmp.ne.s32.totalorder %s78_s20, %s3876_s30  ;;  %p3882_p7 = scmp.lt.s32.totalorder %s3876_s30, %s3876_s30 }
  0x2f   :  { %p3883_p8 = por %p3882_p7, %p3881_p6 }
  0x31   :  { %p3884_p9 = pnand %p3883_p8, %p3877_p5 }
  0x33   :  { %3887 = shalt.err (!%p3884_p9)
}
  0x34   :  { %83 = dma.hbm_to_vmem [thread:$0]  %s4773_s14, 256, %s78_s20, [#allocation6], %s3918_s18, %s3918_s18, %s3919_s19  }
  0x35   :  { %3910 = dma.done.wait [#allocation3], 128  }
  0x36   :  { %3911 = vsyncadd [#allocation3], 4294967168 }
  0x37   :  { %3912 = dma.done.wait [#allocation6], 384  }
  0x38   :  { %3913 = vsyncadd [#allocation6], 4294966912  ;;  %v3921_v0 = vmov 0   ;;  %v3922_v1 = vmov 0.0   ;;  %v269_v2 = vld [vmem:[%s4760_s1] sm:$0xff]  ;;  %s4778_s22 = sld [smem:[#allocation12_spill]]  ;;  %v147_v7 = vlaneseq }
  0x39   :  { %3594 = vset.pattern.permute.xlu0 %v3921_v0  ;;  %3595 = vset.pattern.permute.xlu1 %v3921_v0  ;;  %1477 = vst [vmem:[#allocation8] sm:$0xff] %v3922_v1  ;;  %v3596_v5 = vld [vmem:[#allocation5] sm:$0xff]   ;;  %vm3923_vm0 = vmmov 0   ;;  %v3598_v6 = vld [vmem:[#allocation2] sm:$0xff]   ;;  %vm202_vm3 = vcmask 130048   ;;  %vm346_vm9 = vcmask 261120  }
  0x3a   :  { %3187 = vmatprep.subr.bf16.mxu1 %v3922_v1  ;;  %3173 = vmatprep.subr.bf16.mxu0 %v3922_v1  ;;  %v4085_v8 = vand.u32 127, %v147_v7  ;;  %v4093_v12 = vld [vmem:[%s4764_s5] sm:$0xff]   ;;  %v4103_v17 = vld [vmem:[%s4764_s5 + $0x8] sm:$0xff]  }
  0x3b   :  { %271 = vperm.xlu0 %3594, %v269_v2   ;;  %3188 = vmatpush3.bf16.msra.mxu1 %v3596_v5  ;;  %v4125_v23 = vld [vmem:[%s4766_s7] ss:$0 sm:$0xff]  ;;  %s3924_s7 = smov 32   ;;  %v4157_v50 = vld [vmem:[%s4765_s6 + $0x8] sm:$0xff]  }
  0x3c   :  { %3189 = vmatprep.mubr.msk.bf16.mxu1 %vm3923_vm0, %v3922_v1  ;;  %3193 = vmatprep.subr.bf16.mxu1 %v3922_v1  ;;  %v4151_v49 = vld [vmem:[%s4765_s6] sm:$0xff]   ;;  %v4172_v52 = vld [vmem:[%s4763_s4 + $0x8] sm:$0xff]  }
  0x3d   :  { %3175 = vmatprep.mubr.msk.bf16.mxu0 %vm3923_vm0, %v3922_v1  ;;  %3174 = vmatpush3.bf16.msra.mxu0 %v3598_v6  ;;  %v4164_v51 = vld [vmem:[%s4763_s4] sm:$0xff]  }
  0x3e   :  { %v142_v3 = vld [vmem:[%s4778_s22 + $0x8] sm:$0xff]  ;;  %v141_v4 = vld [vmem:[%s4778_s22] sm:$0xff]  ;;  %3217 = vmatprep.subr.bf16.mxu0 %v3922_v1  ;;  %v143_v41 = vld [vmem:[%s4778_s22 + $0x10] sm:$0xff] }
  0x3f   :  { %153 = vperm.xlu1 %3595, %v142_v3   ;;  %150 = vperm.xlu0 %3594, %v141_v4   ;;  %v145_v42 = vld [vmem:[%s4778_s22 + $0x20] sm:$0xff]  ;;  %v144_v47 = vld [vmem:[%s4778_s22 + $0x18] sm:$0xff]  ;;  %v146_v48 = vld [vmem:[%s4778_s22 + $0x28] sm:$0xff] }
  0xba   :  { %v272_v9 = vpop.permute.xlu0 %271 }
  0xbb   :  { %vm273_vm1 = vcmp.eq.s32.totalorder %v272_v9, %v4085_v8 }
  0xbc   :  { %v2958_v11 = vsel %vm273_vm1, 1.0, %v3922_v1 }
  0xbd   :  { %v276_v13 = vpack.c.bf16 %v2958_v11, %v2958_v11 }
  0xbe   :  { %v154_v10 = vpop.permute.xlu1 %153  ;;  %v151_v15 = vpop.permute.xlu0 %150 }
  0xbf   :  { %vm168_vm2 = vcmp.eq.s32.totalorder %v154_v10, %v4085_v8  ;;  %vm167_vm4 = vcmp.eq.s32.totalorder %v151_v15, %v4085_v8  ;;  %3190 = vmatmul.mubr.msk.bf16.vlgmr.msra.gmra.mrb[0].mxu1 %vm202_vm3, %v276_v13  ;;  %v4219_v13 = vld [vmem:[%s4767_s8] ss:$0 sm:$0xff] }
  0xc0   :  { %v2948_v14 = vsel %vm168_vm2, 1.0, %v3922_v1  ;;  %v2947_v16 = vsel %vm167_vm4, 1.0, %v3922_v1  ;;  %3194 = vmatpush3.bf16.msra.mxu1 %v4093_v12  ;;  %3197 = vmatprep.mubr.msk.bf16.mxu1 %vm3923_vm0, %v3922_v1 }
  0xc1   :  { %v185_v18 = vpack.c.bf16 %v2948_v14, %v2947_v16  ;;  %3195 = vmatprep.subr.bf16.mxu1 %v3922_v1 }
  0xc3   :  { %3176 = vmatmul.mubr.msk.bf16.vlgmr.msra.gmra.mrb[0].mxu0 %vm202_vm3, %v185_v18 }
  0xc4   :  { %3196 = vmatpush3.bf16.msra.mxu1 %v4103_v17  ;;  %3179 = vmatprep.mubr.msk.bf16.mxu0 %vm3923_vm0, %v3922_v1 }
  0xc5   :  { %3201 = vmatprep.subr.bf16.mxu1 %v3922_v1  ;;  %3218 = vmatpush3.bf16.msra.mxu0 %v4093_v12 }
  0xc6   :  { %3219 = vmatprep.subr.bf16.mxu0 %v3922_v1 }
  0xc7   :  { %3198 = vmatmul.mubr.bf16.vlgmr.msra.gmra.mrb[4].mxu1 %v3921_v0 }
  0xc8   :  { %3205 = vmatprep.mubr.msk.bf16.mxu1 %vm3923_vm0, %v3922_v1  ;;  %3202 = vmatpush3.bf16.msra.mxu1 %v4151_v49 }
  0xc9   :  { %3220 = vmatpush3.bf16.msra.mxu0 %v4103_v17  ;;  %3203 = vmatprep.subr.bf16.mxu1 %v3922_v1 }
  0xca   :  { %3225 = vmatprep.subr.bf16.mxu0 %v3922_v1 }
  0xcc   :  { %3204 = vmatpush3.bf16.msra.mxu1 %v4157_v50 }
  0xcd   :  { %3209 = vmatprep.subr.bf16.mxu1 %v3922_v1 }
  0xcf   :  { %3206 = vmatmul.mubr.bf16.vlgmr.msra.gmra.mrb[8].mxu1 %v3921_v0 }
  0xd0   :  { %3210 = vmatpush3.bf16.msra.mxu1 %v4164_v51  ;;  %3213 = vmatprep.mubr.msk.bf16.mxu1 %vm3923_vm0, %v3922_v1 }
  0xd1   :  { %3211 = vmatprep.subr.bf16.mxu1 %v3922_v1 }
  0xd4   :  { %3212 = vmatpush3.bf16.msra.mxu1 %v4172_v52 }
  0xd5   :  { %3241 = vmatprep.subr.bf16.mxu1 %v3922_v1 }
 0x192   :  { %v4120_v19 = vpop.f32.mrb[0].mxu1 }
 0x193   :  { %v3191_v20 = vpop.f32.mrb[1].mxu1 }
 0x194   :  { %v331_v21 = vpop.f32.mrb[2].mxu1 }
 0x195   :  { %v3192_v22 = vpop.f32.mrb[3].mxu1 }
 0x196   :  { %v246_v24 = vpop.f32.mrb[0].mxu0 }
 0x197   :  { %v3177_v25 = vpop.f32.mrb[1].mxu0  ;;  %v247_v27 = vadd.f32 %v4125_v23, %v246_v24 }
 0x198   :  { %v4127_v26 = vpop.f32.mrb[2].mxu0 }
 0x199   :  { %v3178_v28 = vpop.f32.mrb[3].mxu0  ;;  %v250_v14 = vadd.f32 %v4125_v23, %v4127_v26 }
 0x19a   :  { %v384_v29 = vpop.f32.mrb[4].mxu1 }
 0x19b   :  { %v390_v30 = vadd.f32 %v384_v29, %v247_v27  ;;  %v3199_v31 = vpop.f32.mrb[5].mxu1 }
 0x19c   :  { %v387_v32 = vpop.f32.mrb[6].mxu1 }
 0x19d   :  { %3612 = vtanh.f32 %v390_v30  ;;  %v3200_v33 = vpop.f32.mrb[7].mxu1  ;;  %v2964_v35 = vmul.f32 -1.442695, %v390_v30 }
 0x19f   :  { %3614 = vpow2.f32 %v2964_v35 }
 0x1a7   :  { %v3613_v34 = vpop.eup %3612 }
 0x1a8   :  { %400 = vrot.lane.b32.xlu1 %v3613_v34, %s3918_s18 }
 0x1a9   :  { %v3615_v36 = vpop.eup %3614 }
 0x1aa   :  { %v394_v37 = vadd.f32 1.0, %v3615_v36 }
 0x1ac   :  { %3616 = vrcp.f32 %v394_v37 }
 0x1b6   :  { %v3617_v38 = vpop.eup %3616 }
 0x1b7   :  { %v398_v43 = vmul.f32 0.0, %v3617_v38 }
 0x21a   :  { %v401_v39 = vpop.permute.xlu1 %400 }
 0x21b   :  { %v403_v40 = vmul.f32 %v3617_v38, %v401_v39 }
 0x21d   :  { %405 = vrot.lane.b32.xlu0 %v403_v40, %s3924_s7 }
 0x221   :  { %156 = vperm.xlu0 %3594, %v143_v41  }
 0x225   :  { %162 = vperm.xlu0 %3594, %v145_v42  }
 0x28f   :  { %v406_v44 = vpop.permute.xlu0 %405 }
 0x290   :  { %v4138_v45 = vadd.f32 %v406_v44, %v398_v43 }
 0x292   :  { %3618 = vtanh.f32 %v4138_v45 }
 0x29c   :  { %v3619_v46 = vpop.eup %3618 }
 0x29d   :  { %411 = vrot.lane.b32.xlu1 %v3619_v46, %s3918_s18 }
 0x2a0   :  { %v157_v56 = vpop.permute.xlu0 %156 }
 0x2a1   :  { %159 = vperm.xlu1 %3595, %v144_v47   ;;  %vm169_vm5 = vcmp.eq.s32.totalorder %v157_v56, %v4085_v8 }
 0x2a2   :  { %v2949_v58 = vsel %vm169_vm5, 1.0, %v3922_v1 }
 0x2a4   :  { %v163_v61 = vpop.permute.xlu0 %162 }
 0x2a5   :  { %165 = vperm.xlu1 %3595, %v146_v48   ;;  %vm171_vm8 = vcmp.eq.s32.totalorder %v163_v61, %v4085_v8 }
 0x2a6   :  { %v2951_v0 = vsel %vm171_vm8, 1.0, %v3922_v1 }
 0x30f   :  { %v412_v53 = vpop.permute.xlu1 %411 }
 0x310   :  { %v414_v54 = vmul.f32 %v3617_v38, %v412_v53 }
 0x312   :  { %v467_v55 = vpack.c.bf16 %v414_v54, %v414_v54 }
 0x314   :  { %469 = vrot.lane.b32.xlu0 %v467_v55, %s3924_s7 }
 0x320   :  { %v160_v57 = vpop.permute.xlu1 %159 }
 0x321   :  { %vm170_vm6 = vcmp.eq.s32.totalorder %v160_v57, %v4085_v8 }
 0x322   :  { %v2950_v59 = vsel %vm170_vm6, 1.0, %v3922_v1 }
 0x323   :  { %v186_v60 = vpack.c.bf16 %v2950_v59, %v2949_v58 }
 0x324   :  { %v166_v62 = vpop.permute.xlu1 %165 }
 0x325   :  { %vm172_vm7 = vcmp.eq.s32.totalorder %v166_v62, %v4085_v8  ;;  %3180 = vmatmul.mubr.msk.bf16.gmra.mrb[4].mxu0 %vm202_vm3, %v186_v60 }
 0x326   :  { %3183 = vmatprep.mubr.msk.bf16.mxu0 %vm3923_vm0, %v3922_v1  ;;  %v2952_v63 = vsel %vm172_vm7, 1.0, %v3922_v1 }
 0x327   :  { %v187_v2 = vpack.c.bf16 %v2952_v63, %v2951_v0 }
 0x32d   :  { %3184 = vmatmul.mubr.msk.bf16.gmra.mrb[8].mxu0 %vm202_vm3, %v187_v2 }
 0x32e   :  { %3221 = vmatprep.mubr.msk.bf16.mxu0 %vm3923_vm0, %v3922_v1 }
 0x386   :  { %v470_v3 = vpop.permute.xlu0 %469 }
 0x387   :  { %3214 = vmatmul.mubr.msk.bf16.vlgmr.msra.gmra.mrb[8].mxu1 %vm346_vm9, %v470_v3  ;;  %3222 = vmatmul.mubr.msk.bf16.vlgmr.msra.gmra.mrb[12].mxu0 %vm346_vm9, %v470_v3 }
 0x388   :  { %3226 = vmatpush3.bf16.msra.mxu0 %v4151_v49  ;;  %3242 = vmatpush3.bf16.msra.mxu1 %v4093_v12 }
 0x389   :  { %3227 = vmatprep.subr.bf16.mxu0 %v3922_v1  ;;  %3243 = vmatprep.subr.bf16.mxu1 %v3922_v1 }
 0x38a   :  { %3229 = vmatprep.mubr.msk.bf16.mxu0 %vm3923_vm0, %v3922_v1  ;;  %3245 = vmatprep.mubr.msk.bf16.mxu1 %vm3923_vm0, %v3922_v1 }
 0x38c   :  { %3228 = vmatpush3.bf16.msra.mxu0 %v4157_v50  ;;  %3244 = vmatpush3.bf16.msra.mxu1 %v4103_v17 }
 0x38d   :  { %3233 = vmatprep.subr.bf16.mxu0 %v3922_v1  ;;  %3249 = vmatprep.subr.bf16.mxu1 %v3922_v1 }
 0x3f8   :  { %v4208_v4 = vpop.f32.mrb[4].mxu0 }
 0x3f9   :  { %v3181_v5 = vpop.f32.mrb[5].mxu0  ;;  %v255_v62 = vadd.f32 %v4125_v23, %v4208_v4 }
 0x3fa   :  { %v4210_v6 = vpop.f32.mrb[6].mxu0 }
 0x3fb   :  { %v3182_v7 = vpop.f32.mrb[7].mxu0 }
 0x400   :  { %v4212_v8 = vpop.f32.mrb[8].mxu0 }
 0x401   :  { %v3185_v9 = vpop.f32.mrb[9].mxu0 }
 0x402   :  { %v4214_v10 = vpop.f32.mrb[10].mxu0 }
 0x403   :  { %v3186_v11 = vpop.f32.mrb[11].mxu0 }
 0x45a   :  { %v520_v15 = vpop.f32.mrb[8].mxu1  ;;  %v586_v16 = vpop.f32.mrb[12].mxu0 }
 0x45b   :  { %v526_v18 = vadd.f32 %v4219_v13, %v520_v15  ;;  %v592_v20 = vadd.f32 %v586_v16, %v250_v14  ;;  %v3215_v21 = vpop.f32.mrb[9].mxu1  ;;  %v3223_v22 = vpop.f32.mrb[13].mxu0 }
 0x45c   :  { %v523_v24 = vpop.f32.mrb[10].mxu1  ;;  %v589_v25 = vpop.f32.mrb[14].mxu0 }
 0x45d   :  { %3620 = vtanh.f32 %v526_v18  ;;  %v3216_v27 = vpop.f32.mrb[11].mxu1  ;;  %v3224_v28 = vpop.f32.mrb[15].mxu0  ;;  %v2970_v26 = vmul.f32 -1.442695, %v526_v18  ;;  %v2972_v31 = vmul.f32 -1.442695, %v592_v20 }
 0x45e   :  { %3622 = vtanh.f32 %v592_v20 }
 0x45f   :  { %3624 = vpow2.f32 %v2970_v26 }
 0x460   :  { %3626 = vpow2.f32 %v2972_v31 }
 0x467   :  { %v3621_v29 = vpop.eup %3620 }
 0x468   :  { %v3623_v30 = vpop.eup %3622  ;;  %537 = vrot.lane.b32.xlu1 %v3621_v29, %s3918_s18 }
 0x469   :  { %602 = vrot.lane.b32.xlu0 %v3623_v30, %s3918_s18  ;;  %v3625_v32 = vpop.eup %3624 }
 0x46a   :  { %v3627_v33 = vpop.eup %3626  ;;  %v531_v34 = vadd.f32 1.0, %v3625_v32 }
 0x46b   :  { %v596_v35 = vadd.f32 1.0, %v3627_v33 }
 0x46c   :  { %3628 = vrcp.f32 %v531_v34 }
 0x46d   :  { %3630 = vrcp.f32 %v596_v35 }
 0x476   :  { %v3629_v36 = vpop.eup %3628 }
 0x477   :  { %v3631_v38 = vpop.eup %3630  ;;  %v535_v42 = vmul.f32 0.0, %v3629_v36 }
 0x478   :  { %v600_v43 = vmul.f32 %v3631_v38, %v4138_v45 }
 0x4da   :  { %v538_v37 = vpop.permute.xlu1 %537 }
 0x4db   :  { %v603_v39 = vpop.permute.xlu0 %602  ;;  %v540_v40 = vmul.f32 %v3629_v36, %v538_v37 }
 0x4dc   :  { %v605_v41 = vmul.f32 %v3631_v38, %v603_v39 }
 0x4dd   :  { %542 = vrot.lane.b32.xlu1 %v540_v40, %s3924_s7 }
 0x4de   :  { %607 = vrot.lane.b32.xlu0 %v605_v41, %s3924_s7 }
 0x54f   :  { %v543_v44 = vpop.permute.xlu1 %542 }
 0x550   :  { %v608_v46 = vpop.permute.xlu0 %607  ;;  %v4229_v47 = vadd.f32 %v543_v44, %v535_v42 }
 0x551   :  { %v4231_v48 = vadd.f32 %v608_v46, %v600_v43 }
 0x552   :  { %3632 = vtanh.f32 %v4229_v47 }
 0x553   :  { %3634 = vtanh.f32 %v4231_v48 }
 0x55c   :  { %v3633_v53 = vpop.eup %3632 }
 0x55d   :  { %v3635_v54 = vpop.eup %3634  ;;  %548 = vrot.lane.b32.xlu1 %v3633_v53, %s3918_s18  ;;  %v258_v53 = vadd.f32 %v4125_v23, %v4210_v6 }
 0x55e   :  { %613 = vrot.lane.b32.xlu0 %v3635_v54, %s3918_s18 }
 0x5cf   :  { %v549_v55 = vpop.permute.xlu1 %548 }
 0x5d0   :  { %v614_v56 = vpop.permute.xlu0 %613  ;;  %v551_v57 = vmul.f32 %v3629_v36, %v549_v55 }
 0x5d1   :  { %v616_v45 = vmul.f32 %v3631_v38, %v614_v56 }
 0x5d2   :  { %v617_v58 = vpack.c.bf16 %v551_v57, %v551_v57 }
 0x5d3   :  { %v664_v59 = vpack.c.bf16 %v616_v45, %v616_v45 }
 0x5d4   :  { %619 = vrot.lane.b32.xlu1 %v617_v58, %s3924_s7 }
 0x5d5   :  { %666 = vrot.lane.b32.xlu0 %v664_v59, %s3924_s7 }
 0x646   :  { %v620_v60 = vpop.permute.xlu1 %619 }
 0x647   :  { %v667_v61 = vpop.permute.xlu0 %666  ;;  %3230 = vmatmul.mubr.msk.bf16.vlgmr.msra.gmra.mrb[16].mxu0 %vm346_vm9, %v620_v60 }
 0x648   :  { %3234 = vmatpush3.bf16.msra.mxu0 %v4164_v51  ;;  %3246 = vmatmul.mubr.msk.bf16.vlgmr.msra.gmra.mrb[12].mxu1 %vm346_vm9, %v667_v61 }
 0x649   :  { %3235 = vmatprep.subr.bf16.mxu0 %v3922_v1  ;;  %3237 = vmatprep.mubr.msk.bf16.mxu0 %vm3923_vm0, %v3922_v1 }
 0x64a   :  { %3250 = vmatpush3.bf16.msra.mxu1 %v4151_v49  ;;  %3253 = vmatprep.mubr.msk.bf16.mxu1 %vm3923_vm0, %v3922_v1 }
 0x64b   :  { %3251 = vmatprep.subr.bf16.mxu1 %v3922_v1 }
 0x64c   :  { %3236 = vmatpush3.bf16.msra.mxu0 %v4172_v52 }
 0x64d   :  { %3265 = vmatprep.subr.bf16.mxu0 %v3922_v1 }
 0x64e   :  { %3252 = vmatpush3.bf16.msra.mxu1 %v4157_v50 }
 0x64f   :  { %3257 = vmatprep.subr.bf16.mxu1 %v3922_v1 }
 0x653   :  { %3238 = vmatmul.mubr.msk.bf16.vlgmr.msra.gmra.mrb[16].mxu0 %vm346_vm9, %v667_v61 }
 0x654   :  { %3266 = vmatpush3.bf16.msra.mxu0 %v4093_v12  ;;  %3269 = vmatprep.mubr.msk.bf16.mxu0 %vm3923_vm0, %v3922_v1 }
 0x655   :  { %3267 = vmatprep.subr.bf16.mxu0 %v3922_v1 }
 0x658   :  { %3268 = vmatpush3.bf16.msra.mxu0 %v4103_v17 }
 0x659   :  { %3273 = vmatprep.subr.bf16.mxu0 %v3922_v1 }
 0x71b   :  { %v771_v63 = vpop.f32.mrb[12].mxu1 }
 0x71c   :  { %v777_v0 = vadd.f32 %v771_v63, %v255_v62  ;;  %v3247_v2 = vpop.f32.mrb[13].mxu1 }
 0x71d   :  { %v774_v3 = vpop.f32.mrb[14].mxu1 }
 0x71e   :  { %3636 = vtanh.f32 %v777_v0  ;;  %v3248_v5 = vpop.f32.mrb[15].mxu1  ;;  %v2977_v4 = vmul.f32 -1.442695, %v777_v0 }
 0x726   :  { %v705_v7 = vpop.f32.mrb[16].mxu0 }
 0x727   :  { %v711_v9 = vadd.f32 %v4219_v13, %v705_v7  ;;  %v3239_v11 = vpop.f32.mrb[17].mxu0 }
 0x728   :  { %v3637_v14 = vpop.eup %3636  ;;  %v708_v15 = vpop.f32.mrb[18].mxu0 }
 0x729   :  { %3638 = vtanh.f32 %v711_v9  ;;  %787 = vrot.lane.b32.xlu0 %v3637_v14, %s3918_s18  ;;  %v3240_v16 = vpop.f32.mrb[19].mxu0  ;;  %v2975_v20 = vmul.f32 -1.442695, %v711_v9 }
 0x72a   :  { %3640 = vpow2.f32 %v2977_v4 }
 0x72b   :  { %3642 = vpow2.f32 %v2975_v20 }
 0x733   :  { %v3639_v18 = vpop.eup %3638 }
 0x734   :  { %722 = vrot.lane.b32.xlu1 %v3639_v18, %s3918_s18  ;;  %v3641_v21 = vpop.eup %3640 }
 0x735   :  { %v781_v22 = vadd.f32 1.0, %v3641_v21  ;;  %v3643_v24 = vpop.eup %3642 }
 0x736   :  { %v716_v25 = vadd.f32 1.0, %v3643_v24 }
 0x737   :  { %3644 = vrcp.f32 %v781_v22 }
 0x738   :  { %3646 = vrcp.f32 %v716_v25 }
 0x741   :  { %v3645_v27 = vpop.eup %3644 }
 0x742   :  { %v3647_v30 = vpop.eup %3646  ;;  %v785_v32 = vmul.f32 %v3645_v27, %v4231_v48 }
 0x743   :  { %v720_v35 = vmul.f32 %v3647_v30, %v4229_v47 }
 0x79b   :  { %v788_v28 = vpop.permute.xlu0 %787 }
 0x79c   :  { %v790_v29 = vmul.f32 %v3645_v27, %v788_v28 }
 0x79e   :  { %792 = vrot.lane.b32.xlu0 %v790_v29, %s3924_s7 }
 0x7a6   :  { %v723_v26 = vpop.permute.xlu1 %722 }
 0x7a7   :  { %v725_v31 = vmul.f32 %v3647_v30, %v723_v26 }
 0x7a9   :  { %727 = vrot.lane.b32.xlu1 %v725_v31, %s3924_s7 }
 0x810   :  { %v793_v33 = vpop.permute.xlu0 %792 }
 0x811   :  { %v4268_v34 = vadd.f32 %v793_v33, %v785_v32 }
 0x813   :  { %3648 = vtanh.f32 %v4268_v34 }
 0x81b   :  { %v728_v36 = vpop.permute.xlu1 %727 }
 0x81c   :  { %v4272_v37 = vadd.f32 %v728_v36, %v720_v35 }
 0x81d   :  { %v3649_v38 = vpop.eup %3648 }
 0x81e   :  { %3650 = vtanh.f32 %v4272_v37  ;;  %798 = vrot.lane.b32.xlu0 %v3649_v38, %s3918_s18 }
 0x828   :  { %v3651_v39 = vpop.eup %3650 }
 0x829   :  { %733 = vrot.lane.b32.xlu1 %v3651_v39, %s3918_s18 }
 0x890   :  { %v799_v40 = vpop.permute.xlu0 %798 }
 0x891   :  { %v801_v41 = vmul.f32 %v3645_v27, %v799_v40 }
 0x893   :  { %v849_v42 = vpack.c.bf16 %v801_v41, %v801_v41 }
 0x895   :  { %851 = vrot.lane.b32.xlu0 %v849_v42, %s3924_s7 }
 0x89b   :  { %v734_v43 = vpop.permute.xlu1 %733 }
 0x89c   :  { %v736_v44 = vmul.f32 %v3647_v30, %v734_v43 }
 0x89e   :  { %v802_v46 = vpack.c.bf16 %v736_v44, %v736_v44 }
 0x8a0   :  { %804 = vrot.lane.b32.xlu1 %v802_v46, %s3924_s7 }
 0x907   :  { %v852_v47 = vpop.permute.xlu0 %851 }
 0x908   :  { %3270 = vmatmul.mubr.msk.bf16.vlgmr.msra.gmra.mrb[20].mxu0 %vm346_vm9, %v852_v47 }
 0x909   :  { %3274 = vmatpush3.bf16.msra.mxu0 %v4151_v49  ;;  %3277 = vmatprep.mubr.msk.bf16.mxu0 %vm3923_vm0, %v3922_v1 }
 0x90a   :  { %3275 = vmatprep.subr.bf16.mxu0 %v3922_v1 }
 0x90d   :  { %3276 = vmatpush3.bf16.msra.mxu0 %v4157_v50 }
 0x90e   :  { %3281 = vmatprep.subr.bf16.mxu0 %v3922_v1 }
 0x912   :  { %v805_v48 = vpop.permute.xlu1 %804 }
 0x913   :  { %3254 = vmatmul.mubr.msk.bf16.vlgmr.msra.gmra.mrb[16].mxu1 %vm346_vm9, %v805_v48 }
 0x914   :  { %3258 = vmatpush3.bf16.msra.mxu1 %v4164_v51  ;;  %3261 = vmatprep.mubr.msk.bf16.mxu1 %vm3923_vm0, %v3922_v1 }
 0x915   :  { %3259 = vmatprep.subr.bf16.mxu1 %v3922_v1 }
 0x918   :  { %3260 = vmatpush3.bf16.msra.mxu1 %v4172_v52 }
 0x919   :  { %3289 = vmatprep.subr.bf16.mxu1 %v3922_v1 }
 0x91f   :  { %3262 = vmatmul.mubr.msk.bf16.vlgmr.msra.gmra.mrb[16].mxu1 %vm346_vm9, %v852_v47 }
 0x920   :  { %3290 = vmatpush3.bf16.msra.mxu1 %v4093_v12  ;;  %3293 = vmatprep.mubr.msk.bf16.mxu1 %vm3923_vm0, %v3922_v1 }
 0x921   :  { %3291 = vmatprep.subr.bf16.mxu1 %v3922_v1 }
 0x924   :  { %3292 = vmatpush3.bf16.msra.mxu1 %v4103_v17 }
 0x925   :  { %3297 = vmatprep.subr.bf16.mxu1 %v3922_v1 }
 0x9db   :  { %v956_v54 = vpop.f32.mrb[20].mxu0 }
 0x9dc   :  { %v962_v55 = vadd.f32 %v956_v54, %v258_v53  ;;  %v3271_v56 = vpop.f32.mrb[21].mxu0 }
 0x9dd   :  { %v959_v57 = vpop.f32.mrb[22].mxu0 }
 0x9de   :  { %3652 = vtanh.f32 %v962_v55  ;;  %v3272_v45 = vpop.f32.mrb[23].mxu0  ;;  %v2982_v6 = vmul.f32 -1.442695, %v962_v55 }
 0x9e8   :  { %v3653_v58 = vpop.eup %3652 }
 0x9e9   :  { %972 = vrot.lane.b32.xlu0 %v3653_v58, %s3918_s18 }
 0x9f2   :  { %v890_v59 = vpop.f32.mrb[16].mxu1 }
 0x9f3   :  { %v896_v60 = vadd.f32 %v4219_v13, %v890_v59  ;;  %v3263_v61 = vpop.f32.mrb[17].mxu1 }
 0x9f4   :  { %v893_v62 = vpop.f32.mrb[18].mxu1 }
 0x9f5   :  { %3654 = vtanh.f32 %v896_v60  ;;  %v3264_v63 = vpop.f32.mrb[19].mxu1  ;;  %v2980_v5 = vmul.f32 -1.442695, %v896_v60 }
 0x9f6   :  { %3656 = vpow2.f32 %v2982_v6 }
 0x9ff   :  { %v3655_v0 = vpop.eup %3654 }
 0xa00   :  { %907 = vrot.lane.b32.xlu1 %v3655_v0, %s3918_s18  ;;  %v3657_v2 = vpop.eup %3656 }
 0xa01   :  { %v966_v3 = vadd.f32 1.0, %v3657_v2 }
 0xa03   :  { %3658 = vrcp.f32 %v966_v3 }
 0xa04   :  { %3660 = vpow2.f32 %v2980_v5 }
 0xa0d   :  { %v3659_v7 = vpop.eup %3658 }
 0xa0e   :  { %v3661_v14 = vpop.eup %3660  ;;  %v970_v20 = vmul.f32 %v3659_v7, %v4268_v34 }
 0xa0f   :  { %v901_v15 = vadd.f32 1.0, %v3661_v14 }
 0xa11   :  { %3662 = vrcp.f32 %v901_v15 }
 0xa1b   :  { %v3663_v16 = vpop.eup %3662 }
 0xa1c   :  { %v905_v25 = vmul.f32 %v3663_v16, %v4272_v37  ;;  %v263_v37 = vadd.f32 %v4125_v23, %v4212_v8 }
 0xa5b   :  { %v973_v9 = vpop.permute.xlu0 %972 }
 0xa5c   :  { %v975_v11 = vmul.f32 %v3659_v7, %v973_v9 }
 0xa5e   :  { %977 = vrot.lane.b32.xlu0 %v975_v11, %s3924_s7 }
 0xa72   :  { %v908_v18 = vpop.permute.xlu1 %907 }
 0xa73   :  { %v910_v4 = vmul.f32 %v3663_v16, %v908_v18 }
 0xa75   :  { %912 = vrot.lane.b32.xlu1 %v910_v4, %s3924_s7 }
 0xad0   :  { %v978_v21 = vpop.permute.xlu0 %977 }
 0xad1   :  { %v4308_v22 = vadd.f32 %v978_v21, %v970_v20 }
 0xad3   :  { %3664 = vtanh.f32 %v4308_v22 }
 0xadd   :  { %v3665_v24 = vpop.eup %3664 }
 0xade   :  { %983 = vrot.lane.b32.xlu0 %v3665_v24, %s3918_s18 }
 0xae7   :  { %v913_v27 = vpop.permute.xlu1 %912 }
 0xae8   :  { %v4313_v28 = vadd.f32 %v913_v27, %v905_v25 }
 0xaea   :  { %3666 = vtanh.f32 %v4313_v28 }
 0xaf4   :  { %v3667_v29 = vpop.eup %3666 }
 0xaf5   :  { %918 = vrot.lane.b32.xlu1 %v3667_v29, %s3918_s18 }
 0xb50   :  { %v984_v30 = vpop.permute.xlu0 %983 }
 0xb51   :  { %v986_v26 = vmul.f32 %v3659_v7, %v984_v30 }
 0xb53   :  { %v1034_v31 = vpack.c.bf16 %v986_v26, %v986_v26 }
 0xb55   :  { %1036 = vrot.lane.b32.xlu0 %v1034_v31, %s3924_s7 }
 0xb67   :  { %v919_v32 = vpop.permute.xlu1 %918 }
 0xb68   :  { %v921_v33 = vmul.f32 %v3663_v16, %v919_v32 }
 0xb6a   :  { %v987_v34 = vpack.c.bf16 %v921_v33, %v921_v33 }
 0xb6c   :  { %989 = vrot.lane.b32.xlu1 %v987_v34, %s3924_s7 }
 0xbc7   :  { %v1037_v35 = vpop.permute.xlu0 %1036 }
 0xbc8   :  { %3294 = vmatmul.mubr.msk.bf16.vlgmr.msra.gmra.mrb[20].mxu1 %vm346_vm9, %v1037_v35 }
 0xbc9   :  { %3298 = vmatpush3.bf16.msra.mxu1 %v4151_v49  ;;  %3301 = vmatprep.mubr.msk.bf16.mxu1 %vm3923_vm0, %v3922_v1 }
 0xbca   :  { %3299 = vmatprep.subr.bf16.mxu1 %v3922_v1 }
 0xbcd   :  { %3300 = vmatpush3.bf16.msra.mxu1 %v4157_v50 }
 0xbce   :  { %3305 = vmatprep.subr.bf16.mxu1 %v3922_v1 }
 0xbde   :  { %v990_v36 = vpop.permute.xlu1 %989 }
 0xbdf   :  { %3278 = vmatmul.mubr.msk.bf16.vlgmr.msra.gmra.mrb[24].mxu0 %vm346_vm9, %v990_v36 }
 0xbe0   :  { %3282 = vmatpush3.bf16.msra.mxu0 %v4164_v51  ;;  %3285 = vmatprep.mubr.msk.bf16.mxu0 %vm3923_vm0, %v3922_v1 }
 0xbe1   :  { %3283 = vmatprep.subr.bf16.mxu0 %v3922_v1 }
 0xbe4   :  { %3284 = vmatpush3.bf16.msra.mxu0 %v4172_v52 }
 0xbe5   :  { %3313 = vmatprep.subr.bf16.mxu0 %v3922_v1 }
 0xbeb   :  { %3286 = vmatmul.mubr.msk.bf16.vlgmr.msra.gmra.mrb[24].mxu0 %vm346_vm9, %v1037_v35 }
 0xbec   :  { %3314 = vmatpush3.bf16.msra.mxu0 %v4093_v12  ;;  %3317 = vmatprep.mubr.msk.bf16.mxu0 %vm3923_vm0, %v3922_v1 }
 0xbed   :  { %3315 = vmatprep.subr.bf16.mxu0 %v3922_v1 }
 0xbf0   :  { %3316 = vmatpush3.bf16.msra.mxu0 %v4103_v17 }
 0xbf1   :  { %3321 = vmatprep.subr.bf16.mxu0 %v3922_v1 }
 0xc9b   :  { %v1141_v38 = vpop.f32.mrb[20].mxu1 }
 0xc9c   :  { %v1147_v39 = vadd.f32 %v1141_v38, %v263_v37  ;;  %v3295_v40 = vpop.f32.mrb[21].mxu1 }
 0xc9d   :  { %v1144_v41 = vpop.f32.mrb[22].mxu1 }
 0xc9e   :  { %3668 = vtanh.f32 %v1147_v39  ;;  %v3296_v42 = vpop.f32.mrb[23].mxu1  ;;  %v2987_v8 = vmul.f32 -1.442695, %v1147_v39 }
 0xca8   :  { %v3669_v43 = vpop.eup %3668 }
 0xca9   :  { %1157 = vrot.lane.b32.xlu0 %v3669_v43, %s3918_s18 }
 0xcbe   :  { %v1075_v12 = vpop.f32.mrb[24].mxu0 }
 0xcbf   :  { %v1081_v44 = vadd.f32 %v4219_v13, %v1075_v12  ;;  %v3287_v46 = vpop.f32.mrb[25].mxu0 }
 0xcc0   :  { %v1078_v47 = vpop.f32.mrb[26].mxu0 }
 0xcc1   :  { %3670 = vtanh.f32 %v1081_v44  ;;  %v3288_v17 = vpop.f32.mrb[27].mxu0  ;;  %v2985_v45 = vmul.f32 -1.442695, %v1081_v44 }
 0xcc2   :  { %3672 = vpow2.f32 %v2987_v8  ;;  %v4395_v8 = vld [vmem:[%s4769_s10] sm:$0xff]  }
 0xccb   :  { %v3671_v48 = vpop.eup %3670 }
 0xccc   :  { %1092 = vrot.lane.b32.xlu1 %v3671_v48, %s3918_s18  ;;  %v3673_v53 = vpop.eup %3672 }
 0xccd   :  { %v1151_v54 = vadd.f32 1.0, %v3673_v53  ;;  %v4401_v53 = vld [vmem:[%s4769_s10 + $0x8] sm:$0xff]  }
 0xccf   :  { %3674 = vrcp.f32 %v1151_v54  ;;  %v4403_v54 = vld [vmem:[#allocation8] sm:$0xff] }
 0xcd0   :  { %3676 = vpow2.f32 %v2985_v45 }
 0xcd9   :  { %v3675_v55 = vpop.eup %3674 }
 0xcda   :  { %v3677_v58 = vpop.eup %3676  ;;  %v1155_v63 = vmul.f32 %v3675_v55, %v4308_v22 }
 0xcdb   :  { %v1086_v59 = vadd.f32 1.0, %v3677_v58 }
 0xcdd   :  { %3678 = vrcp.f32 %v1086_v59 }
 0xce7   :  { %v3679_v60 = vpop.eup %3678 }
 0xce8   :  { %v1090_v3 = vmul.f32 %v3679_v60, %v4313_v28 }
 0xd1b   :  { %v1158_v56 = vpop.permute.xlu0 %1157 }
 0xd1c   :  { %v1160_v57 = vmul.f32 %v3675_v55, %v1158_v56 }
 0xd1e   :  { %1162 = vrot.lane.b32.xlu0 %v1160_v57, %s3924_s7 }
 0xd3e   :  { %v1093_v61 = vpop.permute.xlu1 %1092 }
 0xd3f   :  { %v1095_v62 = vmul.f32 %v3679_v60, %v1093_v61 }
 0xd41   :  { %1097 = vrot.lane.b32.xlu1 %v1095_v62, %s3924_s7 }
 0xd90   :  { %v1163_v0 = vpop.permute.xlu0 %1162 }
 0xd91   :  { %v4348_v6 = vadd.f32 %v1163_v0, %v1155_v63 }
 0xd93   :  { %3680 = vtanh.f32 %v4348_v6 }
 0xd9d   :  { %v3681_v2 = vpop.eup %3680 }
 0xd9e   :  { %1168 = vrot.lane.b32.xlu0 %v3681_v2, %s3918_s18 }
 0xdb3   :  { %v1098_v5 = vpop.permute.xlu1 %1097 }
 0xdb4   :  { %v4353_v7 = vadd.f32 %v1098_v5, %v1090_v3 }
 0xdb6   :  { %3682 = vtanh.f32 %v4353_v7 }
 0xdc0   :  { %v3683_v9 = vpop.eup %3682 }
 0xdc1   :  { %1103 = vrot.lane.b32.xlu1 %v3683_v9, %s3918_s18 }
 0xe10   :  { %v1169_v11 = vpop.permute.xlu0 %1168 }
 0xe11   :  { %v1171_v14 = vmul.f32 %v3675_v55, %v1169_v11 }
 0xe13   :  { %v1219_v15 = vpack.c.bf16 %v1171_v14, %v1171_v14 }
 0xe15   :  { %1221 = vrot.lane.b32.xlu0 %v1219_v15, %s3924_s7 }
 0xe33   :  { %v1104_v16 = vpop.permute.xlu1 %1103 }
 0xe34   :  { %v1106_v18 = vmul.f32 %v3679_v60, %v1104_v16 }
 0xe36   :  { %v1172_v4 = vpack.c.bf16 %v1106_v18, %v1106_v18 }
 0xe38   :  { %1174 = vrot.lane.b32.xlu1 %v1172_v4, %s3924_s7 }
 0xe87   :  { %v1222_v20 = vpop.permute.xlu0 %1221 }
 0xe88   :  { %3318 = vmatmul.mubr.msk.bf16.vlgmr.msra.gmra.mrb[28].mxu0 %vm346_vm9, %v1222_v20 }
 0xe89   :  { %3322 = vmatpush3.bf16.msra.mxu0 %v4151_v49  ;;  %3325 = vmatprep.mubr.msk.bf16.mxu0 %vm3923_vm0, %v3922_v1  ;;  %v266_v49 = vadd.f32 %v4125_v23, %v4214_v10 }
 0xe8a   :  { %3323 = vmatprep.subr.bf16.mxu0 %v3922_v1 }
 0xe8d   :  { %3324 = vmatpush3.bf16.msra.mxu0 %v4157_v50 }
 0xe8e   :  { %3329 = vmatprep.subr.bf16.mxu0 %v3922_v1 }
 0xeaa   :  { %v1175_v21 = vpop.permute.xlu1 %1174 }
 0xeab   :  { %3302 = vmatmul.mubr.msk.bf16.vlgmr.msra.gmra.mrb[24].mxu1 %vm346_vm9, %v1175_v21 }
 0xeac   :  { %3306 = vmatpush3.bf16.msra.mxu1 %v4164_v51  ;;  %3309 = vmatprep.mubr.msk.bf16.mxu1 %vm3923_vm0, %v3922_v1 }
 0xead   :  { %3307 = vmatprep.subr.bf16.mxu1 %v3922_v1 }
 0xeb0   :  { %3308 = vmatpush3.bf16.msra.mxu1 %v4172_v52 }
 0xeb1   :  { %3337 = vmatprep.subr.bf16.mxu1 %v3922_v1 }
 0xeb7   :  { %3310 = vmatmul.mubr.msk.bf16.vlgmr.msra.gmra.mrb[24].mxu1 %vm346_vm9, %v1222_v20 }
 0xeb8   :  { %3341 = vmatprep.mubr.msk.bf16.mxu1 %vm3923_vm0, %v3922_v1  ;;  %3338 = vmatpush3.bf16.msra.mxu1 %v4395_v8 }
 0xeb9   :  { %3339 = vmatprep.subr.bf16.mxu1 %v4403_v54 }
 0xebc   :  { %3340 = vmatpush3.bf16.msra.mxu1 %v4401_v53 }
 0xebd   :  { %3345 = vmatprep.subr.bf16.mxu1 %v4403_v54 }
 0xf5b   :  { %v1326_v50 = vpop.f32.mrb[28].mxu0 }
 0xf5c   :  { %v1332_v22 = vadd.f32 %v1326_v50, %v266_v49  ;;  %v3319_v24 = vpop.f32.mrb[29].mxu0 }
 0xf5d   :  { %v1329_v25 = vpop.f32.mrb[30].mxu0 }
 0xf5e   :  { %3684 = vtanh.f32 %v1332_v22  ;;  %v3320_v27 = vpop.f32.mrb[31].mxu0  ;;  %v2992_v23 = vmul.f32 -1.442695, %v1332_v22 }
 0xf68   :  { %v3685_v28 = vpop.eup %3684 }
 0xf69   :  { %1342 = vrot.lane.b32.xlu0 %v3685_v28, %s3918_s18 }
 0xf8a   :  { %v1260_v29 = vpop.f32.mrb[24].mxu1 }
 0xf8b   :  { %v1266_v30 = vadd.f32 %v4219_v13, %v1260_v29  ;;  %v3311_v26 = vpop.f32.mrb[25].mxu1 }
 0xf8c   :  { %v1263_v31 = vpop.f32.mrb[26].mxu1 }
 0xf8d   :  { %3686 = vtanh.f32 %v1266_v30  ;;  %v3312_v32 = vpop.f32.mrb[27].mxu1  ;;  %v2990_v37 = vmul.f32 -1.442695, %v1266_v30 }
 0xf8e   :  { %3688 = vpow2.f32 %v2992_v23 }
 0xf97   :  { %v3687_v1 = vpop.eup %3686 }
 0xf98   :  { %1277 = vrot.lane.b32.xlu1 %v3687_v1, %s3918_s18  ;;  %v3689_v10 = vpop.eup %3688 }
 0xf99   :  { %v1336_v33 = vadd.f32 1.0, %v3689_v10  ;;  %v4453_v10 = vld [vmem:[%s4770_s11] sm:$0xff]  }
 0xf9b   :  { %3690 = vrcp.f32 %v1336_v33  ;;  %v4459_v33 = vld [vmem:[%s4770_s11 + $0x8] sm:$0xff]  }
 0xf9c   :  { %3692 = vpow2.f32 %v2990_v37 }
 0xfa5   :  { %v3691_v34 = vpop.eup %3690 }
 0xfa6   :  { %v3693_v38 = vpop.eup %3692  ;;  %v1340_v43 = vmul.f32 %v3691_v34, %v4348_v6 }
 0xfa7   :  { %v1271_v39 = vadd.f32 1.0, %v3693_v38 }
 0xfa9   :  { %3694 = vrcp.f32 %v1271_v39 }
 0xfb3   :  { %v3695_v40 = vpop.eup %3694 }
 0xfb4   :  { %v1275_v47 = vmul.f32 %v3695_v40, %v4353_v7 }
 0xfdb   :  { %v1343_v35 = vpop.permute.xlu0 %1342 }
 0xfdc   :  { %v1345_v36 = vmul.f32 %v3691_v34, %v1343_v35 }
 0xfde   :  { %1347 = vrot.lane.b32.xlu0 %v1345_v36, %s3924_s7 }
0x100a   :  { %v1278_v41 = vpop.permute.xlu1 %1277 }
0x100b   :  { %v1280_v42 = vmul.f32 %v3695_v40, %v1278_v41  ;;  %v4476_v41 = vld [vmem:[%s4768_s9] sm:$0xff]  }
0x100d   :  { %1282 = vrot.lane.b32.xlu1 %v1280_v42, %s3924_s7 }
0x1050   :  { %v1348_v12 = vpop.permute.xlu0 %1347 }
0x1051   :  { %v4384_v44 = vadd.f32 %v1348_v12, %v1340_v43  ;;  %v4483_v43 = vld [vmem:[%s4768_s9 + $0x8] sm:$0xff]  }
0x1053   :  { %3696 = vtanh.f32 %v4384_v44 }
0x105d   :  { %v3697_v46 = vpop.eup %3696 }
0x105e   :  { %1353 = vrot.lane.b32.xlu0 %v3697_v46, %s3918_s18 }
0x107f   :  { %v1283_v17 = vpop.permute.xlu1 %1282 }
0x1080   :  { %v4389_v48 = vadd.f32 %v1283_v17, %v1275_v47 }
0x1082   :  { %3698 = vtanh.f32 %v4389_v48 }
0x108c   :  { %v3699_v55 = vpop.eup %3698 }
0x108d   :  { %1288 = vrot.lane.b32.xlu1 %v3699_v55, %s3918_s18  ;;  %v4502_v55 = vld [vmem:[%s4772_s13] ss:$0 sm:$0xff] }
0x10d0   :  { %v1354_v56 = vpop.permute.xlu0 %1353 }
0x10d1   :  { %v1356_v57 = vmul.f32 %v3691_v34, %v1354_v56 }
0x10d3   :  { %v1404_v45 = vpack.c.bf16 %v1356_v57, %v1356_v57 }
0x10d5   :  { %1406 = vrot.lane.b32.xlu0 %v1404_v45, %s3924_s7 }
0x10ff   :  { %v1289_v58 = vpop.permute.xlu1 %1288 }
0x1100   :  { %v1291_v59 = vmul.f32 %v3695_v40, %v1289_v58 }
0x1102   :  { %v1357_v60 = vpack.c.bf16 %v1291_v59, %v1291_v59 }
0x1104   :  { %1359 = vrot.lane.b32.xlu1 %v1357_v60, %s3924_s7 }
0x1147   :  { %v1407_v61 = vpop.permute.xlu0 %1406 }
0x1148   :  { %3342 = vmatmul.mubr.msk.bf16.vlgmr.msra.gmra.mrb[28].mxu1 %vm346_vm9, %v1407_v61 }
0x1149   :  { %3349 = vmatprep.mubr.msk.bf16.mxu1 %vm3923_vm0, %v4403_v54  ;;  %3346 = vmatpush3.bf16.msra.mxu1 %v4453_v10 }
0x114a   :  { %3347 = vmatprep.subr.bf16.mxu1 %v4403_v54 }
0x114d   :  { %3348 = vmatpush3.bf16.msra.mxu1 %v4459_v33 }
0x114e   :  { %3353 = vmatprep.subr.bf16.mxu1 %v4403_v54 }
0x1176   :  { %v1360_v62 = vpop.permute.xlu1 %1359 }
0x1177   :  { %3326 = vmatmul.mubr.msk.bf16.vlgmr.msra.gmra.mrb[32].mxu0 %vm346_vm9, %v1360_v62 }
0x1178   :  { %3330 = vmatpush3.bf16.msra.mxu0 %v4164_v51  ;;  %3333 = vmatprep.mubr.msk.bf16.mxu0 %vm3923_vm0, %v4403_v54  ;;  %v2959_v51 = vld [vmem:[%s4771_s12] ss:$0 sm:$0xff] }
0x1179   :  { %3331 = vmatprep.subr.bf16.mxu0 %v4403_v54 }
0x117c   :  { %3332 = vmatpush3.bf16.msra.mxu0 %v4172_v52  ;;  %v4432_v52 = vadd.f32 %v2959_v51, %v4120_v19 }
0x117d   :  { %3361 = vmatprep.subr.bf16.mxu0 %v4403_v54 }
0x1183   :  { %3334 = vmatmul.mubr.msk.bf16.vlgmr.msra.gmra.mrb[32].mxu0 %vm346_vm9, %v1407_v61 }
0x1184   :  { %3362 = vmatpush3.bf16.msra.mxu0 %v4395_v8  ;;  %3365 = vmatprep.mubr.msk.bf16.mxu0 %vm3923_vm0, %v4403_v54 }
0x1185   :  { %3363 = vmatprep.subr.bf16.mxu0 %v4403_v54 }
0x1188   :  { %3364 = vmatpush3.bf16.msra.mxu0 %v4401_v53 }
0x1189   :  { %3369 = vmatprep.subr.bf16.mxu0 %v4403_v54 }
0x121b   :  { %v1524_v63 = vpop.f32.mrb[28].mxu1 }
0x121c   :  { %v1530_v0 = vadd.f32 %v1524_v63, %v4432_v52  ;;  %v3343_v6 = vpop.f32.mrb[29].mxu1 }
0x121d   :  { %v1527_v2 = vpop.f32.mrb[30].mxu1 }
0x121e   :  { %3700 = vtanh.f32 %v1530_v0  ;;  %v3344_v3 = vpop.f32.mrb[31].mxu1  ;;  %v2999_v19 = vmul.f32 -1.442695, %v1530_v0 }
0x1228   :  { %v3701_v5 = vpop.eup %3700 }
0x1229   :  { %1540 = vrot.lane.b32.xlu0 %v3701_v5, %s3918_s18 }
0x1256   :  { %v1445_v7 = vpop.f32.mrb[32].mxu0 }
0x1257   :  { %v1451_v9 = vadd.f32 %v4219_v13, %v1445_v7  ;;  %v3335_v11 = vpop.f32.mrb[33].mxu0 }
0x1258   :  { %v1448_v14 = vpop.f32.mrb[34].mxu0 }
0x1259   :  { %3702 = vtanh.f32 %v1451_v9  ;;  %v3336_v15 = vpop.f32.mrb[35].mxu0  ;;  %v2995_v50 = vmul.f32 -1.442695, %v1451_v9 }
0x125a   :  { %3704 = vpow2.f32 %v2999_v19 }
0x1263   :  { %v3703_v16 = vpop.eup %3702 }
0x1264   :  { %1462 = vrot.lane.b32.xlu1 %v3703_v16, %s3918_s18  ;;  %v3705_v18 = vpop.eup %3704 }
0x1265   :  { %v1534_v4 = vadd.f32 1.0, %v3705_v18 }
0x1267   :  { %3706 = vrcp.f32 %v1534_v4 }
0x1268   :  { %3708 = vpow2.f32 %v2995_v50 }
0x1271   :  { %v3707_v20 = vpop.eup %3706 }
0x1272   :  { %v3709_v13 = vpop.eup %3708  ;;  %v1538_v28 = vmul.f32 %v3707_v20, %v4384_v44 }
0x1273   :  { %v1456_v22 = vadd.f32 1.0, %v3709_v13 }
0x1275   :  { %3710 = vrcp.f32 %v1456_v22 }
0x127f   :  { %v3711_v24 = vpop.eup %3710 }
0x1280   :  { %v1460_v31 = vmul.f32 %v3711_v24, %v4389_v48 }
0x129b   :  { %v1541_v21 = vpop.permute.xlu0 %1540 }
0x129c   :  { %v1543_v49 = vmul.f32 %v3707_v20, %v1541_v21 }
0x129e   :  { %1545 = vrot.lane.b32.xlu0 %v1543_v49, %s3924_s7 }
0x12d6   :  { %v1463_v25 = vpop.permute.xlu1 %1462 }
0x12d7   :  { %v1465_v27 = vmul.f32 %v3711_v24, %v1463_v25 }
0x12d9   :  { %1467 = vrot.lane.b32.xlu1 %v1465_v27, %s3924_s7 }
0x1310   :  { %v1546_v29 = vpop.permute.xlu0 %1545 }
0x1311   :  { %v4441_v30 = vadd.f32 %v1546_v29, %v1538_v28 }
0x1313   :  { %3712 = vtanh.f32 %v4441_v30 }
0x131d   :  { %v3713_v26 = vpop.eup %3712 }
0x131e   :  { %1551 = vrot.lane.b32.xlu0 %v3713_v26, %s3918_s18 }
0x134b   :  { %v1468_v32 = vpop.permute.xlu1 %1467 }
0x134c   :  { %v4446_v1 = vadd.f32 %v1468_v32, %v1460_v31 }
0x134e   :  { %3714 = vtanh.f32 %v4446_v1 }
0x1358   :  { %v3715_v23 = vpop.eup %3714 }
0x1359   :  { %1473 = vrot.lane.b32.xlu1 %v3715_v23, %s3918_s18 }
0x1390   :  { %v1552_v34 = vpop.permute.xlu0 %1551 }
0x1391   :  { %v1554_v35 = vmul.f32 %v3707_v20, %v1552_v34 }
0x1393   :  { %v1614_v36 = vpack.c.bf16 %v1554_v35, %v1554_v35 }
0x1395   :  { %1616 = vrot.lane.b32.xlu0 %v1614_v36, %s3924_s7 }
0x13cb   :  { %v1474_v37 = vpop.permute.xlu1 %1473 }
0x13cc   :  { %v1476_v38 = vmul.f32 %v3711_v24, %v1474_v37 }
0x13ce   :  { %v1555_v39 = vpack.c.bf16 %v1476_v38, %v1476_v38 }
0x13d0   :  { %1557 = vrot.lane.b32.xlu1 %v1555_v39, %s3924_s7 }
0x1407   :  { %v1617_v40 = vpop.permute.xlu0 %1616 }
0x1408   :  { %3366 = vmatmul.mubr.msk.bf16.vlgmr.msra.gmra.mrb[36].mxu0 %vm346_vm9, %v1617_v40 }
0x1409   :  { %3370 = vmatpush3.bf16.msra.mxu0 %v4453_v10  ;;  %3373 = vmatprep.mubr.msk.bf16.mxu0 %vm3923_vm0, %v4403_v54 }
0x140a   :  { %3371 = vmatprep.subr.bf16.mxu0 %v4403_v54 }
0x140d   :  { %3372 = vmatpush3.bf16.msra.mxu0 %v4459_v33 }
0x140e   :  { %3377 = vmatprep.subr.bf16.mxu0 %v4403_v54 }
0x1442   :  { %v1558_v42 = vpop.permute.xlu1 %1557 }
0x1443   :  { %3350 = vmatmul.mubr.msk.bf16.vlgmr.msra.gmra.mrb[32].mxu1 %vm346_vm9, %v1558_v42 }
0x1444   :  { %3354 = vmatpush3.bf16.msra.mxu1 %v4476_v41  ;;  %3357 = vmatprep.mubr.msk.bf16.mxu1 %vm3923_vm0, %v4403_v54 }
0x1445   :  { %3355 = vmatprep.subr.bf16.mxu1 %v4403_v54 }
0x1448   :  { %3356 = vmatpush3.bf16.msra.mxu1 %v4483_v43 }
0x1449   :  { %3385 = vmatprep.subr.bf16.mxu1 %v4403_v54 }
0x144f   :  { %3358 = vmatmul.mubr.msk.bf16.vlgmr.msra.gmra.mrb[32].mxu1 %vm346_vm9, %v1617_v40 }
0x1450   :  { %3386 = vmatpush3.bf16.msra.mxu1 %v4395_v8  ;;  %3389 = vmatprep.mubr.msk.bf16.mxu1 %vm3923_vm0, %v4403_v54 }
0x1451   :  { %3387 = vmatprep.subr.bf16.mxu1 %v4403_v54 }
0x1454   :  { %3388 = vmatpush3.bf16.msra.mxu1 %v4401_v53 }
0x1455   :  { %3393 = vmatprep.subr.bf16.mxu1 %v4403_v54 }
0x14db   :  { %v1733_v12 = vpop.f32.mrb[36].mxu0 }
0x14dc   :  { %v1739_v44 = vadd.f32 %v1733_v12, %v4432_v52  ;;  %v3367_v46 = vpop.f32.mrb[37].mxu0 }
0x14dd   :  { %v1736_v47 = vpop.f32.mrb[38].mxu0 }
0x14de   :  { %3716 = vtanh.f32 %v1739_v44  ;;  %v3368_v17 = vpop.f32.mrb[39].mxu0  ;;  %v3008_v61 = vmul.f32 -1.442695, %v1739_v44 }
0x14e8   :  { %v3717_v48 = vpop.eup %3716 }
0x14e9   :  { %1749 = vrot.lane.b32.xlu0 %v3717_v48, %s3918_s18 }
0x1522   :  { %v1667_v56 = vpop.f32.mrb[32].mxu1 }
0x1523   :  { %v1673_v57 = vadd.f32 %v4502_v55, %v1667_v56  ;;  %v3359_v45 = vpop.f32.mrb[33].mxu1 }
0x1524   :  { %v1670_v58 = vpop.f32.mrb[34].mxu1 }
0x1525   :  { %3718 = vtanh.f32 %v1673_v57  ;;  %v3360_v59 = vpop.f32.mrb[35].mxu1  ;;  %v3006_v2 = vmul.f32 -1.442695, %v1673_v57 }
0x1526   :  { %3720 = vpow2.f32 %v3008_v61 }
0x152f   :  { %v3719_v60 = vpop.eup %3718 }
0x1530   :  { %1684 = vrot.lane.b32.xlu1 %v3719_v60, %s3918_s18  ;;  %v3721_v62 = vpop.eup %3720 }
0x1531   :  { %v1743_v51 = vadd.f32 1.0, %v3721_v62 }
0x1533   :  { %3722 = vrcp.f32 %v1743_v51 }
0x1534   :  { %3724 = vpow2.f32 %v3006_v2 }
0x153d   :  { %v3723_v63 = vpop.eup %3722 }
0x153e   :  { %v3725_v3 = vpop.eup %3724  ;;  %v1747_v14 = vmul.f32 %v3723_v63, %v4441_v30 }
0x153f   :  { %v1678_v5 = vadd.f32 1.0, %v3725_v3 }
0x1541   :  { %3726 = vrcp.f32 %v1678_v5 }
0x154b   :  { %v3727_v7 = vpop.eup %3726 }
0x154c   :  { %v1682_v18 = vmul.f32 %v3727_v7, %v4446_v1 }
0x155b   :  { %v1750_v0 = vpop.permute.xlu0 %1749 }
0x155c   :  { %v1752_v6 = vmul.f32 %v3723_v63, %v1750_v0 }
0x155e   :  { %1754 = vrot.lane.b32.xlu0 %v1752_v6, %s3924_s7 }
0x15a2   :  { %v1685_v9 = vpop.permute.xlu1 %1684 }
0x15a3   :  { %v1687_v11 = vmul.f32 %v3727_v7, %v1685_v9 }
0x15a5   :  { %1689 = vrot.lane.b32.xlu1 %v1687_v11, %s3924_s7 }
0x15d0   :  { %v1755_v15 = vpop.permute.xlu0 %1754 }
0x15d1   :  { %v4509_v16 = vadd.f32 %v1755_v15, %v1747_v14 }
0x15d3   :  { %3728 = vtanh.f32 %v4509_v16 }
0x15dd   :  { %v3729_v19 = vpop.eup %3728 }
0x15de   :  { %1760 = vrot.lane.b32.xlu0 %v3729_v19, %s3918_s18 }
0x1617   :  { %v1690_v4 = vpop.permute.xlu1 %1689 }
0x1618   :  { %v4514_v20 = vadd.f32 %v1690_v4, %v1682_v18 }
0x161a   :  { %3730 = vtanh.f32 %v4514_v20 }
0x1624   :  { %v3731_v21 = vpop.eup %3730 }
0x1625   :  { %1695 = vrot.lane.b32.xlu1 %v3731_v21, %s3918_s18 }
0x1650   :  { %v1761_v49 = vpop.permute.xlu0 %1760 }
0x1651   :  { %v1763_v50 = vmul.f32 %v3723_v63, %v1761_v49 }
0x1653   :  { %v1811_v13 = vpack.c.bf16 %v1763_v50, %v1763_v50 }
0x1655   :  { %1813 = vrot.lane.b32.xlu0 %v1811_v13, %s3924_s7 }
0x1697   :  { %v1696_v22 = vpop.permute.xlu1 %1695 }
0x1698   :  { %v4519_v24 = vmul.f32 %v3727_v7, %v1696_v22 }
0x169a   :  { %v1764_v25 = vpack.c.bf16 %v4519_v24, %v4519_v24 }
0x169c   :  { %1766 = vrot.lane.b32.xlu1 %v1764_v25, %s3924_s7 }
0x16c7   :  { %v1814_v27 = vpop.permute.xlu0 %1813 }
0x16c8   :  { %3390 = vmatmul.mubr.msk.bf16.vlgmr.msra.gmra.mrb[36].mxu1 %vm346_vm9, %v1814_v27 }
0x16c9   :  { %3394 = vmatpush3.bf16.msra.mxu1 %v4453_v10  ;;  %3397 = vmatprep.mubr.msk.bf16.mxu1 %vm3923_vm0, %v4403_v54 }
0x16ca   :  { %3395 = vmatprep.subr.bf16.mxu1 %v4403_v54 }
0x16cd   :  { %3396 = vmatpush3.bf16.msra.mxu1 %v4459_v33 }
0x16ce   :  { %3401 = vmatprep.subr.bf16.mxu1 %v4403_v54 }
0x170e   :  { %v1767_v28 = vpop.permute.xlu1 %1766 }
0x170f   :  { %3374 = vmatmul.mubr.msk.bf16.vlgmr.msra.gmra.mrb[40].mxu0 %vm346_vm9, %v1767_v28 }
0x1710   :  { %3378 = vmatpush3.bf16.msra.mxu0 %v4476_v41  ;;  %3381 = vmatprep.mubr.msk.bf16.mxu0 %vm3923_vm0, %v4403_v54 }
0x1711   :  { %3379 = vmatprep.subr.bf16.mxu0 %v4403_v54 }
0x1714   :  { %3380 = vmatpush3.bf16.msra.mxu0 %v4483_v43 }
0x1715   :  { %3409 = vmatprep.subr.bf16.mxu0 %v4403_v54 }
0x171b   :  { %3382 = vmatmul.mubr.msk.bf16.vlgmr.msra.gmra.mrb[40].mxu0 %vm346_vm9, %v1814_v27 }
0x171c   :  { %3410 = vmatpush3.bf16.msra.mxu0 %v4395_v8  ;;  %3413 = vmatprep.mubr.msk.bf16.mxu0 %vm3923_vm0, %v4403_v54 }
0x171d   :  { %3411 = vmatprep.subr.bf16.mxu0 %v4403_v54 }
0x1720   :  { %3412 = vmatpush3.bf16.msra.mxu0 %v4401_v53 }
0x1721   :  { %3417 = vmatprep.subr.bf16.mxu0 %v4403_v54 }
0x179b   :  { %v1918_v29 = vpop.f32.mrb[36].mxu1 }
0x179c   :  { %v1924_v30 = vadd.f32 %v1918_v29, %v4432_v52  ;;  %v3391_v26 = vpop.f32.mrb[37].mxu1 }
0x179d   :  { %v1921_v31 = vpop.f32.mrb[38].mxu1 }
0x179e   :  { %3732 = vtanh.f32 %v1924_v30  ;;  %v3392_v32 = vpop.f32.mrb[39].mxu1  ;;  %v3013_v39 = vmul.f32 -1.442695, %v1924_v30 }
0x17a8   :  { %v3733_v1 = vpop.eup %3732 }
0x17a9   :  { %1934 = vrot.lane.b32.xlu0 %v3733_v1, %s3918_s18 }
0x17ee   :  { %v1852_v23 = vpop.f32.mrb[40].mxu0 }
0x17ef   :  { %v1858_v34 = vadd.f32 %v4502_v55, %v1852_v23  ;;  %v3383_v35 = vpop.f32.mrb[41].mxu0 }
0x17f0   :  { %v1855_v36 = vpop.f32.mrb[42].mxu0 }
0x17f1   :  { %3734 = vtanh.f32 %v1858_v34  ;;  %v3384_v37 = vpop.f32.mrb[43].mxu0  ;;  %v3011_v47 = vmul.f32 -1.442695, %v1858_v34 }
0x17f2   :  { %3736 = vpow2.f32 %v3013_v39 }
0x17fb   :  { %v3735_v38 = vpop.eup %3734 }
0x17fc   :  { %1869 = vrot.lane.b32.xlu1 %v3735_v38, %s3918_s18  ;;  %v3737_v40 = vpop.eup %3736 }
0x17fd   :  { %v1928_v42 = vadd.f32 1.0, %v3737_v40 }
0x17ff   :  { %3738 = vrcp.f32 %v1928_v42 }
0x1800   :  { %3740 = vpow2.f32 %v3011_v47 }
0x1809   :  { %v3739_v12 = vpop.eup %3738 }
0x180a   :  { %v3741_v17 = vpop.eup %3740  ;;  %v1932_v58 = vmul.f32 %v3739_v12, %v4509_v16 }
0x180b   :  { %v1863_v48 = vadd.f32 1.0, %v3741_v17 }
0x180d   :  { %3742 = vrcp.f32 %v1863_v48 }
0x1817   :  { %v3743_v56 = vpop.eup %3742 }
0x1818   :  { %v1867_v62 = vmul.f32 %v3743_v56, %v4514_v20 }
0x181b   :  { %v1935_v44 = vpop.permute.xlu0 %1934 }
0x181c   :  { %v1937_v46 = vmul.f32 %v3739_v12, %v1935_v44 }
0x181e   :  { %1939 = vrot.lane.b32.xlu0 %v1937_v46, %s3924_s7 }
0x186e   :  { %v1870_v57 = vpop.permute.xlu1 %1869 }
0x186f   :  { %v1872_v45 = vmul.f32 %v3743_v56, %v1870_v57 }
0x1871   :  { %1874 = vrot.lane.b32.xlu1 %v1872_v45, %s3924_s7 }
0x1890   :  { %v1940_v59 = vpop.permute.xlu0 %1939 }
0x1891   :  { %v4552_v60 = vadd.f32 %v1940_v59, %v1932_v58 }
0x1893   :  { %3744 = vtanh.f32 %v4552_v60 }
0x189d   :  { %v3745_v61 = vpop.eup %3744 }
0x189e   :  { %1945 = vrot.lane.b32.xlu0 %v3745_v61, %s3918_s18 }
0x18e3   :  { %v1875_v51 = vpop.permute.xlu1 %1874 }
0x18e4   :  { %v4557_v63 = vadd.f32 %v1875_v51, %v1867_v62 }
0x18e6   :  { %3746 = vtanh.f32 %v4557_v63 }
0x18f0   :  { %v3747_v0 = vpop.eup %3746 }
0x18f1   :  { %1880 = vrot.lane.b32.xlu1 %v3747_v0, %s3918_s18 }
0x1910   :  { %v1946_v6 = vpop.permute.xlu0 %1945 }
0x1911   :  { %v1948_v2 = vmul.f32 %v3739_v12, %v1946_v6 }
0x1913   :  { %v1996_v3 = vpack.c.bf16 %v1948_v2, %v1948_v2 }
0x1915   :  { %1998 = vrot.lane.b32.xlu0 %v1996_v3, %s3924_s7 }
0x1963   :  { %v1881_v5 = vpop.permute.xlu1 %1880 }
0x1964   :  { %v4562_v7 = vmul.f32 %v3743_v56, %v1881_v5 }
0x1966   :  { %v1949_v9 = vpack.c.bf16 %v4562_v7, %v4562_v7 }
0x1968   :  { %1951 = vrot.lane.b32.xlu1 %v1949_v9, %s3924_s7 }
0x1987   :  { %v1999_v11 = vpop.permute.xlu0 %1998 }
0x1988   :  { %3414 = vmatmul.mubr.msk.bf16.vlgmr.msra.gmra.mrb[44].mxu0 %vm346_vm9, %v1999_v11 }
0x1989   :  { %3418 = vmatpush3.bf16.msra.mxu0 %v4453_v10  ;;  %3421 = vmatprep.mubr.msk.bf16.mxu0 %vm3923_vm0, %v4403_v54 }
0x198a   :  { %3419 = vmatprep.subr.bf16.mxu0 %v4403_v54 }
0x198d   :  { %3420 = vmatpush3.bf16.msra.mxu0 %v4459_v33 }
0x198e   :  { %3425 = vmatprep.subr.bf16.mxu0 %v4403_v54 }
0x19da   :  { %v1952_v14 = vpop.permute.xlu1 %1951 }
0x19db   :  { %3398 = vmatmul.mubr.msk.bf16.vlgmr.msra.gmra.mrb[40].mxu1 %vm346_vm9, %v1952_v14 }
0x19dc   :  { %3402 = vmatpush3.bf16.msra.mxu1 %v4476_v41  ;;  %3405 = vmatprep.mubr.msk.bf16.mxu1 %vm3923_vm0, %v4403_v54 }
0x19dd   :  { %3403 = vmatprep.subr.bf16.mxu1 %v4403_v54 }
0x19e0   :  { %3404 = vmatpush3.bf16.msra.mxu1 %v4483_v43 }
0x19e1   :  { %3433 = vmatprep.subr.bf16.mxu1 %v4403_v54 }
0x19e7   :  { %3406 = vmatmul.mubr.msk.bf16.vlgmr.msra.gmra.mrb[40].mxu1 %vm346_vm9, %v1999_v11 }
0x19e8   :  { %3434 = vmatpush3.bf16.msra.mxu1 %v4395_v8  ;;  %3437 = vmatprep.mubr.msk.bf16.mxu1 %vm3923_vm0, %v4403_v54 }
0x19e9   :  { %3435 = vmatprep.subr.bf16.mxu1 %v4403_v54 }
0x19ec   :  { %3436 = vmatpush3.bf16.msra.mxu1 %v4401_v53 }
0x19ed   :  { %3441 = vmatprep.subr.bf16.mxu1 %v4403_v54 }
0x1a5b   :  { %v2103_v15 = vpop.f32.mrb[44].mxu0 }
0x1a5c   :  { %v2109_v16 = vadd.f32 %v2103_v15, %v4432_v52  ;;  %v3415_v19 = vpop.f32.mrb[45].mxu0 }
0x1a5d   :  { %v2106_v18 = vpop.f32.mrb[46].mxu0 }
0x1a5e   :  { %3748 = vtanh.f32 %v2109_v16  ;;  %v3416_v4 = vpop.f32.mrb[47].mxu0  ;;  %v3018_v13 = vmul.f32 -1.442695, %v2109_v16 }
0x1a68   :  { %v3749_v20 = vpop.eup %3748 }
0x1a69   :  { %2119 = vrot.lane.b32.xlu0 %v3749_v20, %s3918_s18 }
0x1aba   :  { %v2037_v21 = vpop.f32.mrb[40].mxu1 }
0x1abb   :  { %v2043_v49 = vadd.f32 %v4502_v55, %v2037_v21  ;;  %v3407_v50 = vpop.f32.mrb[41].mxu1 }
0x1abc   :  { %v2040_v22 = vpop.f32.mrb[42].mxu1 }
0x1abd   :  { %3750 = vtanh.f32 %v2043_v49  ;;  %v3408_v25 = vpop.f32.mrb[43].mxu1  ;;  %v3016_v32 = vmul.f32 -1.442695, %v2043_v49 }
0x1abe   :  { %3752 = vpow2.f32 %v3018_v13 }
0x1ac7   :  { %v3751_v27 = vpop.eup %3750 }
0x1ac8   :  { %2054 = vrot.lane.b32.xlu1 %v3751_v27, %s3918_s18  ;;  %v3753_v28 = vpop.eup %3752 }
0x1ac9   :  { %v2113_v29 = vadd.f32 1.0, %v3753_v28 }
0x1acb   :  { %3754 = vrcp.f32 %v2113_v29 }
0x1acc   :  { %3756 = vpow2.f32 %v3016_v32 }
0x1ad5   :  { %v3755_v30 = vpop.eup %3754 }
0x1ad6   :  { %v3757_v1 = vpop.eup %3756  ;;  %v2117_v37 = vmul.f32 %v3755_v30, %v4552_v60 }
0x1ad7   :  { %v2048_v23 = vadd.f32 1.0, %v3757_v1 }
0x1ad9   :  { %3758 = vrcp.f32 %v2048_v23 }
0x1adb   :  { %v2120_v26 = vpop.permute.xlu0 %2119 }
0x1adc   :  { %v2122_v31 = vmul.f32 %v3755_v30, %v2120_v26 }
0x1ade   :  { %2124 = vrot.lane.b32.xlu0 %v2122_v31, %s3924_s7 }
0x1ae3   :  { %v3759_v34 = vpop.eup %3758 }
0x1ae4   :  { %v2052_v42 = vmul.f32 %v3759_v34, %v4557_v63 }
0x1b3a   :  { %v2055_v35 = vpop.permute.xlu1 %2054 }
0x1b3b   :  { %v2057_v36 = vmul.f32 %v3759_v34, %v2055_v35 }
0x1b3d   :  { %2059 = vrot.lane.b32.xlu1 %v2057_v36, %s3924_s7 }
0x1b50   :  { %v2125_v38 = vpop.permute.xlu0 %2124 }
0x1b51   :  { %v4595_v39 = vadd.f32 %v2125_v38, %v2117_v37 }
0x1b53   :  { %3760 = vtanh.f32 %v4595_v39 }
0x1b5d   :  { %v3761_v40 = vpop.eup %3760 }
0x1b5e   :  { %2130 = vrot.lane.b32.xlu0 %v3761_v40, %s3918_s18 }
0x1baf   :  { %v2060_v12 = vpop.permute.xlu1 %2059 }
0x1bb0   :  { %v4600_v44 = vadd.f32 %v2060_v12, %v2052_v42 }
0x1bb2   :  { %3762 = vtanh.f32 %v4600_v44 }
0x1bbc   :  { %v3763_v46 = vpop.eup %3762 }
0x1bbd   :  { %2065 = vrot.lane.b32.xlu1 %v3763_v46, %s3918_s18 }
0x1bd0   :  { %v2131_v47 = vpop.permute.xlu0 %2130 }
0x1bd1   :  { %v2133_v17 = vmul.f32 %v3755_v30, %v2131_v47 }
0x1bd3   :  { %v2181_v48 = vpack.c.bf16 %v2133_v17, %v2133_v17 }
0x1bd5   :  { %2183 = vrot.lane.b32.xlu0 %v2181_v48, %s3924_s7 }
0x1c2f   :  { %v2066_v56 = vpop.permute.xlu1 %2065 }
0x1c30   :  { %v4605_v57 = vmul.f32 %v3759_v34, %v2066_v56 }
0x1c32   :  { %v2134_v45 = vpack.c.bf16 %v4605_v57, %v4605_v57 }
0x1c34   :  { %2136 = vrot.lane.b32.xlu1 %v2134_v45, %s3924_s7 }
0x1c47   :  { %v2184_v58 = vpop.permute.xlu0 %2183 }
0x1c48   :  { %3438 = vmatmul.mubr.msk.bf16.vlgmr.msra.gmra.mrb[44].mxu1 %vm346_vm9, %v2184_v58 }
0x1c49   :  { %3442 = vmatpush3.bf16.msra.mxu1 %v4453_v10  ;;  %3445 = vmatprep.mubr.msk.bf16.mxu1 %vm3923_vm0, %v4403_v54 }
0x1c4a   :  { %3443 = vmatprep.subr.bf16.mxu1 %v4403_v54 }
0x1c4d   :  { %3444 = vmatpush3.bf16.msra.mxu1 %v4459_v33 }
0x1c4e   :  { %3449 = vmatprep.subr.bf16.mxu1 %v4403_v54 }
0x1ca6   :  { %v2137_v59 = vpop.permute.xlu1 %2136 }
0x1ca7   :  { %3422 = vmatmul.mubr.msk.bf16.vlgmr.msra.gmra.mrb[48].mxu0 %vm346_vm9, %v2137_v59 }
0x1ca8   :  { %3426 = vmatpush3.bf16.msra.mxu0 %v4476_v41  ;;  %3429 = vmatprep.mubr.msk.bf16.mxu0 %vm3923_vm0, %v4403_v54 }
0x1ca9   :  { %3427 = vmatprep.subr.bf16.mxu0 %v4403_v54 }
0x1cac   :  { %3428 = vmatpush3.bf16.msra.mxu0 %v4483_v43 }
0x1cad   :  { %3457 = vmatprep.subr.bf16.mxu0 %v4403_v54 }
0x1cb3   :  { %3430 = vmatmul.mubr.msk.bf16.vlgmr.msra.gmra.mrb[48].mxu0 %vm346_vm9, %v2184_v58 }
0x1cb4   :  { %3458 = vmatpush3.bf16.msra.mxu0 %v4395_v8  ;;  %3461 = vmatprep.mubr.msk.bf16.mxu0 %vm3923_vm0, %v4403_v54 }
0x1cb5   :  { %3459 = vmatprep.subr.bf16.mxu0 %v4403_v54 }
0x1cb8   :  { %3460 = vmatpush3.bf16.msra.mxu0 %v4401_v53 }
0x1cb9   :  { %3465 = vmatprep.subr.bf16.mxu0 %v4403_v54 }
0x1d1b   :  { %v2288_v60 = vpop.f32.mrb[44].mxu1 }
0x1d1c   :  { %v2294_v61 = vadd.f32 %v2288_v60, %v4432_v52  ;;  %v3439_v62 = vpop.f32.mrb[45].mxu1 }
0x1d1d   :  { %v2291_v51 = vpop.f32.mrb[46].mxu1 }
0x1d1e   :  { %3764 = vtanh.f32 %v2294_v61  ;;  %v3440_v63 = vpop.f32.mrb[47].mxu1  ;;  %v3023_v6 = vmul.f32 -1.442695, %v2294_v61 }
0x1d20   :  { %3766 = vpow2.f32 %v3023_v6 }
0x1d28   :  { %v3765_v0 = vpop.eup %3764 }
0x1d29   :  { %2304 = vrot.lane.b32.xlu0 %v3765_v0, %s3918_s18 }
0x1d2a   :  { %v3767_v14 = vpop.eup %3766 }
0x1d2b   :  { %v2298_v15 = vadd.f32 1.0, %v3767_v14 }
0x1d86   :  { %v2222_v2 = vpop.f32.mrb[48].mxu0 }
0x1d87   :  { %v2228_v3 = vadd.f32 %v4502_v55, %v2222_v2  ;;  %v3431_v5 = vpop.f32.mrb[49].mxu0 }
0x1d88   :  { %v2225_v9 = vpop.f32.mrb[50].mxu0 }
0x1d89   :  { %3768 = vtanh.f32 %v2228_v3  ;;  %v3432_v11 = vpop.f32.mrb[51].mxu0  ;;  %v3021_v20 = vmul.f32 -1.442695, %v2228_v3 }
0x1d8a   :  { %3770 = vrcp.f32 %v2298_v15 }
0x1d8b   :  { %3772 = vpow2.f32 %v3021_v20 }
0x1d93   :  { %v3769_v16 = vpop.eup %3768 }
0x1d94   :  { %2239 = vrot.lane.b32.xlu1 %v3769_v16, %s3918_s18  ;;  %v3771_v19 = vpop.eup %3770 }
0x1d95   :  { %v3773_v21 = vpop.eup %3772  ;;  %v2302_v25 = vmul.f32 %v3771_v19, %v4595_v39 }
0x1d96   :  { %v2233_v49 = vadd.f32 1.0, %v3773_v21 }
0x1d98   :  { %3774 = vrcp.f32 %v2233_v49 }
0x1d9b   :  { %v2305_v18 = vpop.permute.xlu0 %2304 }
0x1d9c   :  { %v2307_v4 = vmul.f32 %v3771_v19, %v2305_v18 }
0x1d9e   :  { %2309 = vrot.lane.b32.xlu0 %v2307_v4, %s3924_s7 }
0x1da2   :  { %v3775_v50 = vpop.eup %3774 }
0x1da3   :  { %v2237_v30 = vmul.f32 %v3775_v50, %v4600_v44 }
0x1e06   :  { %v2240_v13 = vpop.permute.xlu1 %2239 }
0x1e07   :  { %v2242_v22 = vmul.f32 %v3775_v50, %v2240_v13 }
0x1e09   :  { %2244 = vrot.lane.b32.xlu1 %v2242_v22, %s3924_s7 }
0x1e10   :  { %v2310_v27 = vpop.permute.xlu0 %2309 }
0x1e11   :  { %v4638_v28 = vadd.f32 %v2310_v27, %v2302_v25 }
0x1e13   :  { %3776 = vtanh.f32 %v4638_v28 }
0x1e1d   :  { %v3777_v29 = vpop.eup %3776 }
0x1e1e   :  { %2315 = vrot.lane.b32.xlu0 %v3777_v29, %s3918_s18 }
0x1e7b   :  { %v2245_v26 = vpop.permute.xlu1 %2244 }
0x1e7c   :  { %v4643_v31 = vadd.f32 %v2245_v26, %v2237_v30 }
0x1e7e   :  { %3778 = vtanh.f32 %v4643_v31 }
0x1e88   :  { %v3779_v32 = vpop.eup %3778 }
0x1e89   :  { %2250 = vrot.lane.b32.xlu1 %v3779_v32, %s3918_s18 }
0x1e90   :  { %v2316_v1 = vpop.permute.xlu0 %2315 }
0x1e91   :  { %v2318_v23 = vmul.f32 %v3771_v19, %v2316_v1 }
0x1e93   :  { %v2366_v34 = vpack.c.bf16 %v2318_v23, %v2318_v23 }
0x1e95   :  { %2368 = vrot.lane.b32.xlu0 %v2366_v34, %s3924_s7 }
0x1efb   :  { %v2251_v35 = vpop.permute.xlu1 %2250 }
0x1efc   :  { %v4648_v36 = vmul.f32 %v3775_v50, %v2251_v35 }
0x1efe   :  { %v2319_v37 = vpack.c.bf16 %v4648_v36, %v4648_v36 }
0x1f00   :  { %2321 = vrot.lane.b32.xlu1 %v2319_v37, %s3924_s7 }
0x1f07   :  { %v2369_v38 = vpop.permute.xlu0 %2368 }
0x1f08   :  { %3462 = vmatmul.mubr.msk.bf16.vlgmr.msra.gmra.mrb[52].mxu0 %vm346_vm9, %v2369_v38 }
0x1f09   :  { %3466 = vmatpush3.bf16.msra.mxu0 %v4453_v10  ;;  %3469 = vmatprep.mubr.msk.bf16.mxu0 %vm3923_vm0, %v4403_v54 }
0x1f0a   :  { %3467 = vmatprep.subr.bf16.mxu0 %v4403_v54 }
0x1f0d   :  { %3468 = vmatpush3.bf16.msra.mxu0 %v4459_v33 }
0x1f0e   :  { %3473 = vmatprep.subr.bf16.mxu0 %v4403_v54 }
0x1f72   :  { %v2322_v39 = vpop.permute.xlu1 %2321 }
0x1f73   :  { %3446 = vmatmul.mubr.msk.bf16.vlgmr.msra.gmra.mrb[48].mxu1 %vm346_vm9, %v2322_v39 }
0x1f74   :  { %3450 = vmatpush3.bf16.msra.mxu1 %v4476_v41  ;;  %3453 = vmatprep.mubr.msk.bf16.mxu1 %vm3923_vm0, %v4403_v54 }
0x1f75   :  { %3451 = vmatprep.subr.bf16.mxu1 %v4403_v54 }
0x1f78   :  { %3452 = vmatpush3.bf16.msra.mxu1 %v4483_v43 }
0x1f79   :  { %3481 = vmatprep.subr.bf16.mxu1 %v4403_v54 }
0x1f7f   :  { %3454 = vmatmul.mubr.msk.bf16.vlgmr.msra.gmra.mrb[48].mxu1 %vm346_vm9, %v2369_v38 }
0x1f80   :  { %3482 = vmatpush3.bf16.msra.mxu1 %v4395_v8  ;;  %3485 = vmatprep.mubr.msk.bf16.mxu1 %vm3923_vm0, %v4403_v54 }
0x1f81   :  { %3483 = vmatprep.subr.bf16.mxu1 %v4403_v54 }
0x1f84   :  { %3484 = vmatpush3.bf16.msra.mxu1 %v4401_v53 }
0x1f85   :  { %3489 = vmatprep.subr.bf16.mxu1 %v4403_v54 }
0x1fdb   :  { %v2473_v40 = vpop.f32.mrb[52].mxu0 }
0x1fdc   :  { %v2479_v42 = vadd.f32 %v2473_v40, %v4432_v52  ;;  %v3463_v12 = vpop.f32.mrb[53].mxu0 }
0x1fdd   :  { %v2476_v44 = vpop.f32.mrb[54].mxu0 }
0x1fde   :  { %3780 = vtanh.f32 %v2479_v42  ;;  %v3464_v46 = vpop.f32.mrb[55].mxu0  ;;  %v3028_v8 = vmul.f32 -1.442695, %v2479_v42 }
0x1fe0   :  { %3782 = vpow2.f32 %v3028_v8 }
0x1fe8   :  { %v3781_v47 = vpop.eup %3780 }
0x1fe9   :  { %2489 = vrot.lane.b32.xlu0 %v3781_v47, %s3918_s18 }
0x1fea   :  { %v3783_v17 = vpop.eup %3782 }
0x1feb   :  { %v2483_v48 = vadd.f32 1.0, %v3783_v17 }
0x1fed   :  { %3784 = vrcp.f32 %v2483_v48 }
0x1ff7   :  { %v3785_v60 = vpop.eup %3784 }
0x1ff8   :  { %v2487_v2 = vmul.f32 %v3785_v60, %v4638_v28 }
0x2052   :  { %v2407_v56 = vpop.f32.mrb[48].mxu1 }
0x2053   :  { %v2413_v53 = vadd.f32 %v4502_v55, %v2407_v56  ;;  %v3455_v45 = vpop.f32.mrb[49].mxu1 }
0x2054   :  { %v2410_v58 = vpop.f32.mrb[50].mxu1 }
0x2055   :  { %3786 = vtanh.f32 %v2413_v53  ;;  %v3456_v59 = vpop.f32.mrb[51].mxu1  ;;  %v3026_v63 = vmul.f32 -1.442695, %v2413_v53 }
0x2057   :  { %3788 = vpow2.f32 %v3026_v63 }
0x205b   :  { %v2490_v61 = vpop.permute.xlu0 %2489 }
0x205c   :  { %v2492_v62 = vmul.f32 %v3785_v60, %v2490_v61 }
0x205e   :  { %2494 = vrot.lane.b32.xlu0 %v2492_v62, %s3924_s7 }
0x205f   :  { %v3787_v51 = vpop.eup %3786 }
0x2060   :  { %2424 = vrot.lane.b32.xlu1 %v3787_v51, %s3918_s18 }
0x2061   :  { %v3789_v0 = vpop.eup %3788 }
0x2062   :  { %v2418_v6 = vadd.f32 1.0, %v3789_v0 }
0x2064   :  { %3790 = vrcp.f32 %v2418_v6 }
0x206e   :  { %v3791_v9 = vpop.eup %3790 }
0x206f   :  { %v2422_v16 = vmul.f32 %v3791_v9, %v4643_v31 }
0x20d0   :  { %v2495_v3 = vpop.permute.xlu0 %2494 }
0x20d1   :  { %v4680_v5 = vadd.f32 %v2495_v3, %v2487_v2  ;;  %v3821_v3 = vld [vmem:[#allocation8] sm:$0xff] }
0x20d2   :  { %v2425_v11 = vpop.permute.xlu1 %2424 }
0x20d3   :  { %3792 = vtanh.f32 %v4680_v5  ;;  %v2427_v14 = vmul.f32 %v3791_v9, %v2425_v11 }
0x20d5   :  { %2429 = vrot.lane.b32.xlu1 %v2427_v14, %s3924_s7 }
0x20dd   :  { %v3793_v15 = vpop.eup %3792 }
0x20de   :  { %2500 = vrot.lane.b32.xlu0 %v3793_v15, %s3918_s18 }
0x2147   :  { %v2430_v19 = vpop.permute.xlu1 %2429 }
0x2148   :  { %v4686_v18 = vadd.f32 %v2430_v19, %v2422_v16 }
0x214a   :  { %3794 = vtanh.f32 %v4686_v18 }
0x2150   :  { %v2501_v4 = vpop.permute.xlu0 %2500 }
0x2151   :  { %v2503_v20 = vmul.f32 %v3785_v60, %v2501_v4 }
0x2153   :  { %v2551_v21 = vpack.c.bf16 %v2503_v20, %v2503_v20 }
0x2154   :  { %v3795_v49 = vpop.eup %3794 }
0x2155   :  { %2553 = vrot.lane.b32.xlu0 %v2551_v21, %s3924_s7  ;;  %2435 = vrot.lane.b32.xlu1 %v3795_v49, %s3918_s18  ;;  %v3610_v49 = vld [vmem:[#allocation7] sm:$0xff]  }
0x21c7   :  { %v2554_v50 = vpop.permute.xlu0 %2553  ;;  %v2436_v13 = vpop.permute.xlu1 %2435 }
0x21c8   :  { %3486 = vmatmul.mubr.msk.bf16.vlgmr.msra.gmra.mrb[52].mxu1 %vm346_vm9, %v2554_v50  ;;  %v4692_v22 = vmul.f32 %v3791_v9, %v2436_v13 }
0x21c9   :  { %3490 = vmatpush3.bf16.msra.mxu1 %v4453_v10  ;;  %3493 = vmatprep.mubr.msk.bf16.mxu1 %vm3923_vm0, %v4403_v54 }
0x21ca   :  { %v2504_v25 = vpack.c.bf16 %v4692_v22, %v4692_v22  ;;  %3491 = vmatprep.subr.bf16.mxu1 %v4403_v54 }
0x21cc   :  { %2506 = vrot.lane.b32.xlu1 %v2504_v25, %s3924_s7 }
0x21cd   :  { %3492 = vmatpush3.bf16.msra.mxu1 %v4459_v33 }
0x21ce   :  { %3497 = vmatprep.subr.bf16.mxu1 %v4403_v54 }
0x223e   :  { %v2507_v27 = vpop.permute.xlu1 %2506 }
0x223f   :  { %3470 = vmatmul.mubr.msk.bf16.vlgmr.msra.gmra.mrb[56].mxu0 %vm346_vm9, %v2507_v27  ;;  %v3611_v27 = vld [vmem:[#allocation7 + $0x8] sm:$0xff]  }
0x2240   :  { %3474 = vmatpush3.bf16.msra.mxu0 %v4476_v41  ;;  %3477 = vmatprep.mubr.msk.bf16.mxu0 %vm3923_vm0, %v4403_v54 }
0x2241   :  { %3475 = vmatprep.subr.bf16.mxu0 %v4403_v54 }
0x2244   :  { %3476 = vmatpush3.bf16.msra.mxu0 %v4483_v43 }
0x2245   :  { %3505 = vmatprep.subr.bf16.mxu0 %v3610_v49 }
0x224b   :  { %3478 = vmatmul.mubr.msk.bf16.vlgmr.msra.gmra.mrb[56].mxu0 %vm346_vm9, %v2554_v50 }
0x224c   :  { %3506 = vmatpush3.bf16.msra.mxu0 %v3610_v49 }
0x224d   :  { %3507 = vmatprep.subr.bf16.mxu0 %v3611_v27 }
0x2250   :  { %3508 = vmatpush3.bf16.msra.mxu0 %v3611_v27 }
0x229b   :  { %v2658_v10 = vpop.f32.mrb[52].mxu1 }
0x229c   :  { %v2664_v28 = vadd.f32 %v2658_v10, %v4432_v52  ;;  %v3487_v33 = vpop.f32.mrb[53].mxu1 }
0x229d   :  { %v2661_v29 = vpop.f32.mrb[54].mxu1 }
0x229e   :  { %3796 = vtanh.f32 %v2664_v28  ;;  %v3488_v30 = vpop.f32.mrb[55].mxu1  ;;  %v3033_v31 = vmul.f32 -1.442695, %v2664_v28 }
0x22a0   :  { %3798 = vpow2.f32 %v3033_v31 }
0x22a8   :  { %v3797_v26 = vpop.eup %3796 }
0x22a9   :  { %2674 = vrot.lane.b32.xlu0 %v3797_v26, %s3918_s18 }
0x22aa   :  { %v3799_v32 = vpop.eup %3798 }
0x22ab   :  { %v2668_v1 = vadd.f32 1.0, %v3799_v32 }
0x22ad   :  { %3800 = vrcp.f32 %v2668_v1 }
0x22b7   :  { %v3801_v54 = vpop.eup %3800 }
0x22b8   :  { %v2672_v44 = vmul.f32 %v3801_v54, %v4680_v5 }
0x231b   :  { %v2675_v23 = vpop.permute.xlu0 %2674 }
0x231c   :  { %v2677_v34 = vmul.f32 %v3801_v54, %v2675_v23 }
0x231e   :  { %2679 = vrot.lane.b32.xlu0 %v2677_v34, %s3924_s7  ;;  %v2592_v35 = vpop.f32.mrb[56].mxu0 }
0x231f   :  { %v2598_v52 = vadd.f32 %v4502_v55, %v2592_v35  ;;  %v3479_v37 = vpop.f32.mrb[57].mxu0 }
0x2320   :  { %v2595_v38 = vpop.f32.mrb[58].mxu0 }
0x2321   :  { %3802 = vtanh.f32 %v2598_v52  ;;  %v3480_v39 = vpop.f32.mrb[59].mxu0  ;;  %v3031_v42 = vmul.f32 -1.442695, %v2598_v52 }
0x2323   :  { %3804 = vpow2.f32 %v3031_v42 }
0x232b   :  { %v3803_v40 = vpop.eup %3802 }
0x232c   :  { %2609 = vrot.lane.b32.xlu1 %v3803_v40, %s3918_s18 }
0x232d   :  { %v3805_v12 = vpop.eup %3804 }
0x232e   :  { %v2603_v46 = vadd.f32 1.0, %v3805_v12 }
0x2390   :  { %v2680_v47 = vpop.permute.xlu0 %2679 }
0x2391   :  { %v2682_v8 = vadd.f32 %v2680_v47, %v2672_v44 }
0x2393   :  { %3806 = vtanh.f32 %v2682_v8 }
0x2394   :  { %3808 = vrcp.f32 %v2603_v46 }
0x239d   :  { %v3807_v17 = vpop.eup %3806 }
0x239e   :  { %v3809_v48 = vpop.eup %3808  ;;  %2685 = vrot.lane.b32.xlu0 %v3807_v17, %s3918_s18  ;;  %v2610_v56 = vpop.permute.xlu1 %2609 }
0x239f   :  { %v2612_v53 = vmul.f32 %v3809_v48, %v2610_v56  ;;  %v2607_v59 = vmul.f32 %v3809_v48, %v4686_v18 }
0x23a1   :  { %2614 = vrot.lane.b32.xlu1 %v2612_v53, %s3924_s7 }
0x2410   :  { %v2686_v45 = vpop.permute.xlu0 %2685 }
0x2411   :  { %v2688_v58 = vmul.f32 %v3801_v54, %v2686_v45 }
0x2413   :  { %v2736_v60 = vpack.c.bf16 %v2688_v58, %v2688_v58  ;;  %v2615_v61 = vpop.permute.xlu1 %2614 }
0x2414   :  { %v2617_v62 = vadd.f32 %v2615_v61, %v2607_v59 }
0x2415   :  { %2738 = vrot.lane.b32.xlu0 %v2736_v60, %s3924_s7 }
0x2416   :  { %3810 = vtanh.f32 %v2617_v62 }
0x2420   :  { %v3811_v51 = vpop.eup %3810 }
0x2421   :  { %2620 = vrot.lane.b32.xlu1 %v3811_v51, %s3918_s18 }
0x2487   :  { %v2739_v5 = vpop.permute.xlu0 %2738 }
0x2493   :  { %v2621_v63 = vpop.permute.xlu1 %2620 }
0x2494   :  { %v2623_v0 = vmul.f32 %v3809_v48, %v2621_v63 }
0x2496   :  { %v2689_v6 = vpack.c.bf16 %v2623_v0, %v2623_v0  ;;  %v2811_v50 = vpack.c.bf16 %v2623_v0, %v4692_v22 }
0x2498   :  { %2691 = vrot.lane.b32.xlu1 %v2689_v6, %s3924_s7 }
0x250a   :  { %v2692_v2 = vpop.permute.xlu1 %2691 }
0x250b   :  { %3494 = vmatmul.mubr.msk.bf16.vlgmr.msra.gmra.mrb[56].mxu1 %vm346_vm9, %v2692_v2 }
0x250c   :  { %3498 = vmatpush3.bf16.msra.mxu1 %v4476_v41  ;;  %3501 = vmatprep.mubr.msk.bf16.mxu1 %vm3923_vm0, %v3821_v3 }
0x250d   :  { %3499 = vmatprep.subr.bf16.mxu1 %v3821_v3 }
0x2510   :  { %3500 = vmatpush3.bf16.msra.mxu1 %v4483_v43 }
0x2517   :  { %3502 = vmatmul.mubr.msk.bf16.vlgmr.msra.gmra.mrb[56].mxu1 %vm346_vm9, %v2739_v5 }
0x25ea   :  { %v2777_v9 = vpop.f32.mrb[56].mxu1 }
0x25eb   :  { %v2783_v11 = vadd.f32 %v4502_v55, %v2777_v9  ;;  %v3503_v14 = vpop.f32.mrb[57].mxu1  ;;  %v2809_v55 = vpack.c.bf16 %v4562_v7, %v4519_v24  ;;  %v2810_v7 = vpack.c.bf16 %v4648_v36, %v4605_v57  ;;  %v3037_v57 = vld [vmem:[%s4774_s15] ss:$0 sm:$0xff] }
0x25ec   :  { %v2780_v15 = vpop.f32.mrb[58].mxu1 }
0x25ed   :  { %3812 = vtanh.f32 %v2783_v11  ;;  %v3504_v16 = vpop.f32.mrb[59].mxu1  ;;  %v3036_v41 = vmul.f32 -1.442695, %v2783_v11 }
0x25ef   :  { %3814 = vpow2.f32 %v3036_v41 }
0x25f7   :  { %v3813_v19 = vpop.eup %3812 }
0x25f8   :  { %2794 = vrot.lane.b32.xlu1 %v3813_v19, %s3918_s18 }
0x25f9   :  { %v3815_v18 = vpop.eup %3814 }
0x25fa   :  { %v2788_v4 = vadd.f32 1.0, %v3815_v18 }
0x25fc   :  { %3816 = vrcp.f32 %v2788_v4 }
0x2606   :  { %v3817_v20 = vpop.eup %3816 }
0x2607   :  { %v2792_v13 = vmul.f32 %v3817_v20, %v2617_v62 }
0x266a   :  { %v2795_v43 = vpop.permute.xlu1 %2794 }
0x266b   :  { %v2797_v21 = vmul.f32 %v3817_v20, %v2795_v43 }
0x266d   :  { %2799 = vrot.lane.b32.xlu0 %v2797_v21, %s3924_s7 }
0x2671   :  { %2823 = vrot.lane.b32.xlu0 %v2809_v55, %s3924_s7 }
0x2675   :  { %2827 = vrot.lane.b32.xlu0 %v2811_v50, %s3924_s7 }
0x26df   :  { %v2800_v25 = vpop.permute.xlu0 %2799 }
0x26e0   :  { %v2802_v10 = vadd.f32 %v2800_v25, %v2792_v13 }
0x26e2   :  { %3818 = vtanh.f32 %v2802_v10 }
0x26e3   :  { %v2824_v28 = vpop.permute.xlu0 %2823 }
0x26e4   :  { %3509 = vmatprep.mubr.msk.bf16.mxu0 %vm346_vm9, %v2824_v28 }
0x26e7   :  { %v2828_v26 = vpop.permute.xlu0 %2827 }
0x26ec   :  { %v3819_v24 = vpop.eup %3818 }
0x26ed   :  { %2805 = vrot.lane.b32.xlu1 %v3819_v24, %s3918_s18 }
0x26f1   :  { %2825 = vrot.lane.b32.xlu1 %v2810_v7, %s3924_s7 }
0x275f   :  { %v2806_v22 = vpop.permute.xlu1 %2805 }
0x2760   :  { %v2808_v33 = vmul.f32 %v3817_v20, %v2806_v22 }
0x2762   :  { %v2812_v29 = vpack.c.bf16 %v2808_v33, %v2808_v33 }
0x2763   :  { %v2826_v30 = vpop.permute.xlu1 %2825 }
0x2764   :  { %2829 = vrot.lane.b32.xlu1 %v2812_v29, %s3924_s7  ;;  %3510 = vmatmul.mubr.msk.bf16.vlgmr.msra.gmra.mrb[60].mxu0 %vm346_vm9, %v2826_v30  ;;  %s3925_s7 = smov [#allocation8]  }
0x2765   :  { %3513 = vmatprep.mubr.msk.bf16.mxu0 %vm346_vm9, %v2828_v26  ;;  %s2932_s14 = sshll.u32 %s3925_s7, 4  ;;  %s2933_s14 = int_to_ptr.vmem [resolvable:$true] %s2932_s14 }
0x2766   :  { %s3888_s15 = scalar_lea.vmem %s2933_s14, 1024  ;;  %p3893_p11 = scmp.lt.s32.totalorder %s2933_s14, %s2933_s14 }
0x2767   :  { %p3889_p10 = scmp.ne.s32.totalorder %s2933_s14, %s3888_s15  ;;  %p3894_p12 = scmp.lt.s32.totalorder %s3888_s15, %s3888_s15 }
0x2769   :  { %p3895_p13 = por %p3894_p12, %p3893_p11 }
0x276b   :  { %p3896_p0 = pnand %p3895_p13, %p3889_p10 }
0x27d6   :  { %v2830_v31 = vpop.permute.xlu1 %2829 }
0x27d7   :  { %3514 = vmatmul.mubr.msk.bf16.gmra.mrb[64].mxu0 %vm346_vm9, %v2830_v31 }
0x2837   :  { %v3511_v36 = vpop.f32.mrb[60].mxu0 }
0x2838   :  { %v2898_v32 = vadd.f32 %v3511_v36, %v3037_v57  ;;  %v2889_v1 = vpop.f32.mrb[61].mxu0 }
0x2839   :  { %v2890_v54 = vadd.f32 %v3037_v57, %v2889_v1  ;;  %v3512_v23 = vpop.f32.mrb[62].mxu0 }
0x283a   :  { %2922 = vst [vmem:[#allocation8 + $0x18] sm:$0xff] %v2898_v32  ;;  %v2901_v34 = vadd.f32 %v3512_v23, %v3037_v57  ;;  %v2892_v35 = vpop.f32.mrb[63].mxu0 }
0x283b   :  { %2920 = vst [vmem:[#allocation8 + $0x8] sm:$0xff] %v2890_v54  ;;  %v2893_v52 = vadd.f32 %v3037_v57, %v2892_v35 }
0x283c   :  { %2923 = vst [vmem:[#allocation8 + $0x20] sm:$0xff] %v2901_v34 }
0x283d   :  { %2921 = vst [vmem:[#allocation8 + $0x10] sm:$0xff] %v2893_v52 }
0x28aa   :  { %v3515_v37 = vpop.f32.mrb[64].mxu0 }
0x28ab   :  { %v2914_v38 = vadd.f32 %v3515_v37, %v3037_v57  ;;  %v2905_v39 = vpop.f32.mrb[65].mxu0 }
0x28ac   :  { %v2906_v40 = vadd.f32 %v3037_v57, %v2905_v39  ;;  %v3516_v42 = vpop.f32.mrb[66].mxu0 }
0x28ad   :  { %2926 = vst [vmem:[#allocation8 + $0x38] sm:$0xff] %v2914_v38  ;;  %v2908_v12 = vpop.f32.mrb[67].mxu0 }
0x28ae   :  { %2924 = vst [vmem:[#allocation8 + $0x28] sm:$0xff] %v2906_v40  ;;  %v2909_v44 = vadd.f32 %v3037_v57, %v2908_v12 }
0x28b0   :  { %2925 = vst [vmem:[#allocation8 + $0x30] sm:$0xff] %v2909_v44 }
0x28b1   :  { %3899 = shalt.err (!%p3896_p0)
}
0x28b2   :  { %s3900_s20 = scalar_lea.hbm %s4775_s16, 1024 }
0x28b3   :  { %p3901_p1 = scmp.ne.s32.totalorder %s4775_s16, %s3900_s20  ;;  %p3904_p2 = scmp.lt.u32.totalorder %s3900_s20, %s4775_s16 }
0x28b5   :  { %p3906_p3 = pnand %p3904_p2, %p3901_p1 }
0x28b7   :  { %3909 = shalt.err (!%p3906_p3)
}
0x28b8   :  { %s3926_s4 = smov 128   ;;  %s3927_s6 = smov 8  }
0x28b9   :  { %2938 = dma.vmem_to_hbm [thread:$0]  %s2933_s14, 1024, %s4775_s16, [#allocation4], %s3926_s4, %s3926_s4, %s3927_s6  }
0x28ba   :  { %3914 = dma.done.wait [#allocation4], 1024  }
0x28bb   :  { %3915 = vsyncadd [#allocation4], 4294966272 }
0x28bc   :  { %2942 = vsyncpa [#allocation3], 1 }
0x28bd   :  { %2943 = vsyncpa [#allocation6], 1 }
0x28be   :  { %2944 = vsyncpa [#allocation4], 1 }

</bundles_post_ra>
